<compile_context>
chip_gen: v6e
topology: v6e:2x2x1
jax: 0.10.0
libtpu: 0.0.40
codegen_flags: <defaults>
</compile_context>

<pallas_src>
import functools

import numpy as np
import jax
import jax.numpy as jnp
from jax.experimental import pallas as pl
from jax.experimental.pallas import tpu as pltpu

sunrgbd_frq = [0.3829, 0.452448, 0.637584, 0.377464, 0.585595, 0.479574,
               0.781544, 0.982534, 1.017466, 0.624581, 2.589096, 0.980794,
               0.92034, 0.667984, 1.172291, 0.86224, 0.921714, 2.154782,
               1.187832, 1.178115, 1.848545, 1.428922, 2.849658, 0.771605,
               1.656668, 4.483506, 2.209922, 1.12028, 2.790182, 0.706519,
               3.994768, 2.220004, 0.972934, 1.481525, 5.342475, 0.750738,
               4.040773]


def _ce_kernel(x_ref, t_ref, loss_ref, cnt_ref, acc_loss, acc_cnt, *,
               n_rows, class_weights):
    """grid = (N, G, T): image (parallel), HW chunk (parallel), tile (arbitrary).

    x_ref:  (1, C, S, 128) logits  -- classes leading, pixels on sublanes+lanes
    t_ref:  (1, S, 128)    int32 labels (0 = ignore)
    loss_ref / cnt_ref: (1, 1, 1, 1) per-(image, chunk) partial sums
    acc_loss / acc_cnt: (S, 128) f32 VMEM accumulators
    """
    t_ax = pl.program_id(2)
    n_t = pl.num_programs(2)

    @pl.when(t_ax == 0)
    def _():
        acc_loss[...] = jnp.zeros_like(acc_loss)
        acc_cnt[...] = jnp.zeros_like(acc_cnt)

    C = x_ref.shape[1]
    S = t_ref.shape[1]

    labels = t_ref[0]                                           # (S, 128)

    # Global (unclamped) pixel-row covered by this tile's sublanes. Ragged /
    # fully out-of-bounds tiles are masked here instead of padding in HBM.
    row0 = (pl.program_id(1) * n_t + t_ax) * S
    local_row = jax.lax.broadcasted_iota(jnp.int32, labels.shape, 0)
    in_bounds = (row0 + local_row) < n_rows                     # (S, 128)

    valid = in_bounds & (labels > 0)                            # (S, 128) bool
    tm = jnp.where(valid, labels - 1, 0)                        # shifted class ids

    # Pass 1: max over classes. Leading-dim reduction -> plain full-vreg maxes.
    x_max = x_ref[0, 0].astype(jnp.float32)
    for c in range(1, C):
        x_max = jnp.maximum(x_max, x_ref[0, c].astype(jnp.float32))

    # Pass 2: exp-sum + target-logit / target-weight selection.
    # Weights are compile-time scalar constants (no (C,1) buffer, no broadcast).
    sum_exp = jnp.zeros_like(x_max)
    x_t = jnp.zeros_like(x_max)
    w_t = jnp.zeros_like(x_max)
    for c in range(C):
        xc = x_ref[0, c].astype(jnp.float32)
        sum_exp = sum_exp + jnp.exp(xc - x_max)
        sel = tm == c
        x_t = jnp.where(sel, xc, x_t)
        w_t = jnp.where(sel, class_weights[c], w_t)
    # TODO(synk): if the EUP binds on v7x, the exp-sum could run in bf16.

    lse = jnp.log(sum_exp) + x_max                              # (S, 128)

    # NaN/Inf-safe masked accumulation: ignored / out-of-bounds pixels add 0.
    acc_loss[...] += jnp.where(valid, w_t * (lse - x_t), 0.0)
    acc_cnt[...] += valid.astype(jnp.float32)

    @pl.when(t_ax == n_t - 1)
    def _():
        loss_ref[...] = jnp.sum(acc_loss[...], keepdims=True)[None, None]
        cnt_ref[...] = jnp.sum(acc_cnt[...], keepdims=True)[None, None]


def cross_entropy_loss_2d(inputs_nchw, targets_nhw, weight, *,
                          tile_hw=8192, hw_chunks=None):
    """Weighted masked CE over one (N, C, H, W) / (N, H, W) scale.

    `inputs_nchw` may be float32 or bfloat16 (upcast to f32 in-kernel).
    `weight` is a length-C list / numpy array (baked into the kernel).
    """
    N, C, H, W = inputs_nchw.shape
    HW = H * W
    R = -(-HW // 128)                 # 128-pixel rows
    HWp = R * 128

    # Free reshapes (contiguous dim splits/merges) -- no NCHW->NHWC transpose.
    x = inputs_nchw.reshape(N, C, HW)
    t = targets_nhw.reshape(N, HW).astype(jnp.int32)
    if HWp != HW:
        # Only when HW is not lane-aligned: pad by <128 pixels, label 0 = ignore.
        x = jnp.pad(x, ((0, 0), (0, 0), (0, HWp - HW)))
        t = jnp.pad(t, ((0, 0), (0, HWp - HW)))
    x = x.reshape(N, C, R, 128)
    t = t.reshape(N, R, 128)

    # Tile size in pixel-rows: big enough to amortize per-step overhead, small
    # enough that double-buffered logits + temporaries fit v7x VMEM comfortably.
    s_def = max(8, tile_hw // 128)
    if R <= s_def:
        S = R                          # single tile, S == full dim (always legal)
        t_total = 1
    else:
        S = (s_def // 8) * 8           # multiple of 8 (sublane constraint)
        t_total = -(-R // S)

    # Optional HW-chunk parallel axis: keeps both v7x TensorCores busy for N==1.
    if hw_chunks is None:
        hw_chunks = 2 if N == 1 else 1
    G = max(1, min(hw_chunks, t_total))
    t_inner = -(-t_total // G)

    w_list = tuple(float(v) for v in np.asarray(weight, dtype=np.float32).reshape(-1))
    assert len(w_list) == C, "weight length must equal the class dimension"

    kernel = functools.partial(_ce_kernel, n_rows=R, class_weights=w_list)

    # Clamp the block index so chunk tails never request a fully OOB block;
    # the kernel's row-validity mask zeroes any such duplicate tile anyway.
    def x_map(n, g, t_):
        return (n, 0, jnp.minimum(g * t_inner + t_, t_total - 1), 0)

    def t_map(n, g, t_):
        return (n, jnp.minimum(g * t_inner + t_, t_total - 1), 0)

    P = N * HW  # real pixel count
    cost = pl.CostEstimate(
        flops=int(P * (7 * C + 12)),
        transcendentals=int(P * (C + 1)),
        bytes_accessed=int(N * C * HWp * x.dtype.itemsize + N * HWp * 4 + 8 * N * G),
    )

    loss_part, cnt_part = pl.pallas_call(
        kernel,
        out_shape=(jax.ShapeDtypeStruct((N, G, 1, 1), jnp.float32),
                   jax.ShapeDtypeStruct((N, G, 1, 1), jnp.float32)),
        grid_spec=pltpu.PrefetchScalarGridSpec(
            num_scalar_prefetch=0,
            grid=(N, G, t_inner),
            in_specs=[
                pl.BlockSpec((1, C, S, 128), x_map),   # logits
                pl.BlockSpec((1, S, 128), t_map),      # labels
            ],
            out_specs=[
                pl.BlockSpec((1, 1, 1, 1), lambda n, g, t_: (n, g, 0, 0)),
                pl.BlockSpec((1, 1, 1, 1), lambda n, g, t_: (n, g, 0, 0)),
            ],
            scratch_shapes=[pltpu.VMEM((S, 128), jnp.float32),
                            pltpu.VMEM((S, 128), jnp.float32)],
        ),
        compiler_params=pltpu.CompilerParams(
            dimension_semantics=("parallel", "parallel", "arbitrary"),
            # 8192-px tiles need only a few MiB; 32 MiB is safe on every gen
            # (v7x physical VMEM is 64 MiB).
            vmem_limit_bytes=32 * 1024 * 1024,
        ),
        cost_estimate=cost,
    )(x, t)

    # Batch-wide mean over valid pixels (matches the PyTorch module per scale).
    return jnp.sum(loss_part) / jnp.sum(cnt_part)


def cross_entropy_loss_2d_scales(inputs_scales, targets_scales, weight, *, tile_hw=8192):
    """Mirror of CrossEntropyLoss2d.forward: sum of per-scale losses."""
    # TODO(synk): scales with only a few hundred pixels could be computed in
    # plain JAX (or fused into one call) to skip the fixed per-launch overhead.
    total = jnp.float32(0.0)
    for inputs, targets in zip(inputs_scales, targets_scales):
        total = total + cross_entropy_loss_2d(inputs, targets, weight, tile_hw=tile_hw)
    return total


def _ref(x, t, w):
    # Pure-JAX reference of the PyTorch forward (single scale).
    N, C, H, W = x.shape
    logp = jax.nn.log_softmax(x.astype(jnp.float32), axis=1)
    mask = t > 0
    tm = jnp.where(mask, t - 1, 0)
    onehot = jax.nn.one_hot(tm, C, axis=1)
    nll = -jnp.sum(logp * onehot, axis=1)
    loss_all = w[tm] * nll
    return jnp.sum(jnp.where(mask, loss_all, 0.0)) / jnp.sum(mask.astype(jnp.float32))


if __name__ == "__main__":
    key = jax.random.PRNGKey(0)
    k1, k2, k3, k4, k5, k6 = jax.random.split(key, 6)
    C = 37  # SUNRGBD -> 37 classes (matches the weight vector)
    w_np = np.asarray(sunrgbd_frq, dtype=np.float32)
    w_jax = jnp.asarray(w_np)

    # Two "scales", as the module consumes lists of (inputs, targets).
    x1 = jax.random.normal(k1, (2, C, 16, 16), dtype=jnp.float32)
    t1 = jax.random.randint(k2, (2, 16, 16), 0, C + 1, dtype=jnp.int32)  # 0 = ignore
    x2 = jax.random.normal(k3, (2, C, 8, 8), dtype=jnp.float32)          # HW%128 != 0 path
    t2 = jax.random.randint(k4, (2, 8, 8), 0, C + 1, dtype=jnp.int32)

    loss = cross_entropy_loss_2d_scales([x1, x2], [t1, t2], w_np)
    jax.block_until_ready(loss)
    ref = _ref(x1, t1, w_jax) + _ref(x2, t2, w_jax)
    np.testing.assert_allclose(np.asarray(loss), np.asarray(ref), rtol=1e-4, atol=1e-5)

    # Exercise the multi-tile accumulation, ragged-tail masking and the
    # N==1 dual-chunk (parallel HW) path with a small tile.
    x3 = jax.random.normal(k5, (1, C, 48, 48), dtype=jnp.float32)
    t3 = jax.random.randint(k6, (1, 48, 48), 0, C + 1, dtype=jnp.int32)
    loss3 = cross_entropy_loss_2d(x3, t3, w_np, tile_hw=1024)
    jax.block_until_ready(loss3)
    ref3 = _ref(x3, t3, w_jax)
    np.testing.assert_allclose(np.asarray(loss3), np.asarray(ref3), rtol=1e-4, atol=1e-5)

    print("KERNEL_OK")
</pallas_src>

<mosaic_0001>
module attributes {stable_mosaic.version = 11 : i64} {
  func.func @_ce_kernel(%arg0: i32, %arg1: i32, %arg2: i32, %arg3: memref<1x37x2x128xf32, #tpu.memory_space<vmem>>, %arg4: memref<1x2x128xi32, #tpu.memory_space<vmem>>, %arg5: memref<1x1x1x1xf32, #tpu.memory_space<vmem>>, %arg6: memref<1x1x1x1xf32, #tpu.memory_space<vmem>>, %arg7: memref<2x128xf32, #tpu.memory_space<vmem>>, %arg8: memref<2x128xf32, #tpu.memory_space<vmem>>) attributes {dimension_semantics = [#tpu.dimension_semantics<parallel>, #tpu.dimension_semantics<parallel>, #tpu.dimension_semantics<arbitrary>], iteration_bounds = array<i64: 2, 1, 1>, scalar_prefetch = 0 : i64, scratch_operands = 2 : i64, tpu.core_type = #tpu.core_type<tc>, window_params = [{transform_indices = @transform_0, window_bounds = array<i64: 1, 37, 2, 128>}, {transform_indices = @transform_1, window_bounds = array<i64: 1, 2, 128>}, {transform_indices = @transform_2, window_bounds = array<i64: 1, 1, 1, 1>}, {transform_indices = @transform_3, window_bounds = array<i64: 1, 1, 1, 1>}]} {
    %c0_i32 = arith.constant 0 : i32
    %0 = arith.cmpi eq, %arg2, %c0_i32 : i32
    %1 = arith.extui %0 : i1 to i32
    %c0_i32_0 = arith.constant 0 : i32
    %2 = arith.cmpi ne, %1, %c0_i32_0 : i32
    scf.if %2 {
      %cst_320 = arith.constant 0.000000e+00 : f32
      %520 = vector.broadcast %cst_320 : f32 to vector<2x128xf32>
      %c0_321 = arith.constant 0 : index
      %c0_322 = arith.constant 0 : index
      %521 = vector.load %arg7[%c0_321, %c0_322] : memref<2x128xf32, #tpu.memory_space<vmem>>, vector<2x128xf32>
      tpu.vector_store %arg7[%c0_321, %c0_322], %520 {strides = array<i32>} : memref<2x128xf32, #tpu.memory_space<vmem>>, vector<2x128xf32>,
      %cst_323 = arith.constant 0.000000e+00 : f32
      %522 = vector.broadcast %cst_323 : f32 to vector<2x128xf32>
      %c0_324 = arith.constant 0 : index
      %c0_325 = arith.constant 0 : index
      %523 = vector.load %arg8[%c0_324, %c0_325] : memref<2x128xf32, #tpu.memory_space<vmem>>, vector<2x128xf32>
      tpu.vector_store %arg8[%c0_324, %c0_325], %522 {strides = array<i32>} : memref<2x128xf32, #tpu.memory_space<vmem>>, vector<2x128xf32>,
    } else {
    }
    %c0 = arith.constant 0 : index
    %c0_1 = arith.constant 0 : index
    %c0_2 = arith.constant 0 : index
    %3 = vector.load %arg4[%c0, %c0_1, %c0_2] : memref<1x2x128xi32, #tpu.memory_space<vmem>>, vector<1x2x128xi32>
    %4 = vector.shape_cast %3 : vector<1x2x128xi32> to vector<2x128xi32>
    %c1_i32 = arith.constant 1 : i32
    %5 = arith.muli %arg1, %c1_i32 : i32
    %6 = arith.addi %5, %arg2 : i32
    %c2_i32 = arith.constant 2 : i32
    %7 = arith.muli %6, %c2_i32 : i32
    %8 = tpu.iota {dimensions = array<i32: 0>} : vector<2x128xi32>
    %9 = vector.broadcast %7 : i32 to vector<2x128xi32>
    %10 = arith.addi %9, %8 : vector<2x128xi32>
    %c2_i32_3 = arith.constant 2 : i32
    %11 = vector.broadcast %c2_i32_3 : i32 to vector<2x128xi32>
    %12 = arith.cmpi slt, %10, %11 : vector<2x128xi32>
    %c0_i32_4 = arith.constant 0 : i32
    %13 = vector.broadcast %c0_i32_4 : i32 to vector<2x128xi32>
    %14 = arith.cmpi sgt, %4, %13 : vector<2x128xi32>
    %15 = arith.andi %12, %14 : vector<2x128xi1>
    %c1_i32_5 = arith.constant 1 : i32
    %16 = vector.broadcast %c1_i32_5 : i32 to vector<2x128xi32>
    %17 = arith.subi %4, %16 : vector<2x128xi32>
    %c0_i32_6 = arith.constant 0 : i32
    %18 = vector.broadcast %c0_i32_6 : i32 to vector<2x128xi32>
    %19 = arith.select %15, %17, %18 : vector<2x128xi1>, vector<2x128xi32>
    %c0_7 = arith.constant 0 : index
    %c0_8 = arith.constant 0 : index
    %c0_9 = arith.constant 0 : index
    %c0_10 = arith.constant 0 : index
    %20 = vector.load %arg3[%c0_7, %c0_8, %c0_9, %c0_10] : memref<1x37x2x128xf32, #tpu.memory_space<vmem>>, vector<1x1x2x128xf32>
    %21 = vector.shape_cast %20 : vector<1x1x2x128xf32> to vector<2x128xf32>
    %c0_11 = arith.constant 0 : index
    %c1 = arith.constant 1 : index
    %c0_12 = arith.constant 0 : index
    %c0_13 = arith.constant 0 : index
    %22 = vector.load %arg3[%c0_11, %c1, %c0_12, %c0_13] : memref<1x37x2x128xf32, #tpu.memory_space<vmem>>, vector<1x1x2x128xf32>
    %23 = vector.shape_cast %22 : vector<1x1x2x128xf32> to vector<2x128xf32>
    %24 = arith.maximumf %21, %23 : vector<2x128xf32>
    %c0_14 = arith.constant 0 : index
    %c2 = arith.constant 2 : index
    %c0_15 = arith.constant 0 : index
    %c0_16 = arith.constant 0 : index
    %25 = vector.load %arg3[%c0_14, %c2, %c0_15, %c0_16] : memref<1x37x2x128xf32, #tpu.memory_space<vmem>>, vector<1x1x2x128xf32>
    %26 = vector.shape_cast %25 : vector<1x1x2x128xf32> to vector<2x128xf32>
    %27 = arith.maximumf %24, %26 : vector<2x128xf32>
    %c0_17 = arith.constant 0 : index
    %c3 = arith.constant 3 : index
    %c0_18 = arith.constant 0 : index
    %c0_19 = arith.constant 0 : index
    %28 = vector.load %arg3[%c0_17, %c3, %c0_18, %c0_19] : memref<1x37x2x128xf32, #tpu.memory_space<vmem>>, vector<1x1x2x128xf32>
    %29 = vector.shape_cast %28 : vector<1x1x2x128xf32> to vector<2x128xf32>
    %30 = arith.maximumf %27, %29 : vector<2x128xf32>
    %c0_20 = arith.constant 0 : index
    %c4 = arith.constant 4 : index
    %c0_21 = arith.constant 0 : index
    %c0_22 = arith.constant 0 : index
    %31 = vector.load %arg3[%c0_20, %c4, %c0_21, %c0_22] : memref<1x37x2x128xf32, #tpu.memory_space<vmem>>, vector<1x1x2x128xf32>
    %32 = vector.shape_cast %31 : vector<1x1x2x128xf32> to vector<2x128xf32>
    %33 = arith.maximumf %30, %32 : vector<2x128xf32>
    %c0_23 = arith.constant 0 : index
    %c5 = arith.constant 5 : index
    %c0_24 = arith.constant 0 : index
    %c0_25 = arith.constant 0 : index
    %34 = vector.load %arg3[%c0_23, %c5, %c0_24, %c0_25] : memref<1x37x2x128xf32, #tpu.memory_space<vmem>>, vector<1x1x2x128xf32>
    %35 = vector.shape_cast %34 : vector<1x1x2x128xf32> to vector<2x128xf32>
    %36 = arith.maximumf %33, %35 : vector<2x128xf32>
    %c0_26 = arith.constant 0 : index
    %c6 = arith.constant 6 : index
    %c0_27 = arith.constant 0 : index
    %c0_28 = arith.constant 0 : index
    %37 = vector.load %arg3[%c0_26, %c6, %c0_27, %c0_28] : memref<1x37x2x128xf32, #tpu.memory_space<vmem>>, vector<1x1x2x128xf32>
    %38 = vector.shape_cast %37 : vector<1x1x2x128xf32> to vector<2x128xf32>
    %39 = arith.maximumf %36, %38 : vector<2x128xf32>
    %c0_29 = arith.constant 0 : index
    %c7 = arith.constant 7 : index
    %c0_30 = arith.constant 0 : index
    %c0_31 = arith.constant 0 : index
    %40 = vector.load %arg3[%c0_29, %c7, %c0_30, %c0_31] : memref<1x37x2x128xf32, #tpu.memory_space<vmem>>, vector<1x1x2x128xf32>
    %41 = vector.shape_cast %40 : vector<1x1x2x128xf32> to vector<2x128xf32>
    %42 = arith.maximumf %39, %41 : vector<2x128xf32>
    %c0_32 = arith.constant 0 : index
    %c8 = arith.constant 8 : index
    %c0_33 = arith.constant 0 : index
    %c0_34 = arith.constant 0 : index
    %43 = vector.load %arg3[%c0_32, %c8, %c0_33, %c0_34] : memref<1x37x2x128xf32, #tpu.memory_space<vmem>>, vector<1x1x2x128xf32>
    %44 = vector.shape_cast %43 : vector<1x1x2x128xf32> to vector<2x128xf32>
    %45 = arith.maximumf %42, %44 : vector<2x128xf32>
    %c0_35 = arith.constant 0 : index
    %c9 = arith.constant 9 : index
    %c0_36 = arith.constant 0 : index
    %c0_37 = arith.constant 0 : index
    %46 = vector.load %arg3[%c0_35, %c9, %c0_36, %c0_37] : memref<1x37x2x128xf32, #tpu.memory_space<vmem>>, vector<1x1x2x128xf32>
    %47 = vector.shape_cast %46 : vector<1x1x2x128xf32> to vector<2x128xf32>
    %48 = arith.maximumf %45, %47 : vector<2x128xf32>
    %c0_38 = arith.constant 0 : index
    %c10 = arith.constant 10 : index
    %c0_39 = arith.constant 0 : index
    %c0_40 = arith.constant 0 : index
    %49 = vector.load %arg3[%c0_38, %c10, %c0_39, %c0_40] : memref<1x37x2x128xf32, #tpu.memory_space<vmem>>, vector<1x1x2x128xf32>
    %50 = vector.shape_cast %49 : vector<1x1x2x128xf32> to vector<2x128xf32>
    %51 = arith.maximumf %48, %50 : vector<2x128xf32>
    %c0_41 = arith.constant 0 : index
    %c11 = arith.constant 11 : index
    %c0_42 = arith.constant 0 : index
    %c0_43 = arith.constant 0 : index
    %52 = vector.load %arg3[%c0_41, %c11, %c0_42, %c0_43] : memref<1x37x2x128xf32, #tpu.memory_space<vmem>>, vector<1x1x2x128xf32>
    %53 = vector.shape_cast %52 : vector<1x1x2x128xf32> to vector<2x128xf32>
    %54 = arith.maximumf %51, %53 : vector<2x128xf32>
    %c0_44 = arith.constant 0 : index
    %c12 = arith.constant 12 : index
    %c0_45 = arith.constant 0 : index
    %c0_46 = arith.constant 0 : index
    %55 = vector.load %arg3[%c0_44, %c12, %c0_45, %c0_46] : memref<1x37x2x128xf32, #tpu.memory_space<vmem>>, vector<1x1x2x128xf32>
    %56 = vector.shape_cast %55 : vector<1x1x2x128xf32> to vector<2x128xf32>
    %57 = arith.maximumf %54, %56 : vector<2x128xf32>
    %c0_47 = arith.constant 0 : index
    %c13 = arith.constant 13 : index
    %c0_48 = arith.constant 0 : index
    %c0_49 = arith.constant 0 : index
    %58 = vector.load %arg3[%c0_47, %c13, %c0_48, %c0_49] : memref<1x37x2x128xf32, #tpu.memory_space<vmem>>, vector<1x1x2x128xf32>
    %59 = vector.shape_cast %58 : vector<1x1x2x128xf32> to vector<2x128xf32>
    %60 = arith.maximumf %57, %59 : vector<2x128xf32>
    %c0_50 = arith.constant 0 : index
    %c14 = arith.constant 14 : index
    %c0_51 = arith.constant 0 : index
    %c0_52 = arith.constant 0 : index
    %61 = vector.load %arg3[%c0_50, %c14, %c0_51, %c0_52] : memref<1x37x2x128xf32, #tpu.memory_space<vmem>>, vector<1x1x2x128xf32>
    %62 = vector.shape_cast %61 : vector<1x1x2x128xf32> to vector<2x128xf32>
    %63 = arith.maximumf %60, %62 : vector<2x128xf32>
    %c0_53 = arith.constant 0 : index
    %c15 = arith.constant 15 : index
    %c0_54 = arith.constant 0 : index
    %c0_55 = arith.constant 0 : index
    %64 = vector.load %arg3[%c0_53, %c15, %c0_54, %c0_55] : memref<1x37x2x128xf32, #tpu.memory_space<vmem>>, vector<1x1x2x128xf32>
    %65 = vector.shape_cast %64 : vector<1x1x2x128xf32> to vector<2x128xf32>
    %66 = arith.maximumf %63, %65 : vector<2x128xf32>
    %c0_56 = arith.constant 0 : index
    %c16 = arith.constant 16 : index
    %c0_57 = arith.constant 0 : index
    %c0_58 = arith.constant 0 : index
    %67 = vector.load %arg3[%c0_56, %c16, %c0_57, %c0_58] : memref<1x37x2x128xf32, #tpu.memory_space<vmem>>, vector<1x1x2x128xf32>
    %68 = vector.shape_cast %67 : vector<1x1x2x128xf32> to vector<2x128xf32>
    %69 = arith.maximumf %66, %68 : vector<2x128xf32>
    %c0_59 = arith.constant 0 : index
    %c17 = arith.constant 17 : index
    %c0_60 = arith.constant 0 : index
    %c0_61 = arith.constant 0 : index
    %70 = vector.load %arg3[%c0_59, %c17, %c0_60, %c0_61] : memref<1x37x2x128xf32, #tpu.memory_space<vmem>>, vector<1x1x2x128xf32>
    %71 = vector.shape_cast %70 : vector<1x1x2x128xf32> to vector<2x128xf32>
    %72 = arith.maximumf %69, %71 : vector<2x128xf32>
    %c0_62 = arith.constant 0 : index
    %c18 = arith.constant 18 : index
    %c0_63 = arith.constant 0 : index
    %c0_64 = arith.constant 0 : index
    %73 = vector.load %arg3[%c0_62, %c18, %c0_63, %c0_64] : memref<1x37x2x128xf32, #tpu.memory_space<vmem>>, vector<1x1x2x128xf32>
    %74 = vector.shape_cast %73 : vector<1x1x2x128xf32> to vector<2x128xf32>
    %75 = arith.maximumf %72, %74 : vector<2x128xf32>
    %c0_65 = arith.constant 0 : index
    %c19 = arith.constant 19 : index
    %c0_66 = arith.constant 0 : index
    %c0_67 = arith.constant 0 : index
    %76 = vector.load %arg3[%c0_65, %c19, %c0_66, %c0_67] : memref<1x37x2x128xf32, #tpu.memory_space<vmem>>, vector<1x1x2x128xf32>
    %77 = vector.shape_cast %76 : vector<1x1x2x128xf32> to vector<2x128xf32>
    %78 = arith.maximumf %75, %77 : vector<2x128xf32>
    %c0_68 = arith.constant 0 : index
    %c20 = arith.constant 20 : index
    %c0_69 = arith.constant 0 : index
    %c0_70 = arith.constant 0 : index
    %79 = vector.load %arg3[%c0_68, %c20, %c0_69, %c0_70] : memref<1x37x2x128xf32, #tpu.memory_space<vmem>>, vector<1x1x2x128xf32>
    %80 = vector.shape_cast %79 : vector<1x1x2x128xf32> to vector<2x128xf32>
    %81 = arith.maximumf %78, %80 : vector<2x128xf32>
    %c0_71 = arith.constant 0 : index
    %c21 = arith.constant 21 : index
    %c0_72 = arith.constant 0 : index
    %c0_73 = arith.constant 0 : index
    %82 = vector.load %arg3[%c0_71, %c21, %c0_72, %c0_73] : memref<1x37x2x128xf32, #tpu.memory_space<vmem>>, vector<1x1x2x128xf32>
    %83 = vector.shape_cast %82 : vector<1x1x2x128xf32> to vector<2x128xf32>
    %84 = arith.maximumf %81, %83 : vector<2x128xf32>
    %c0_74 = arith.constant 0 : index
    %c22 = arith.constant 22 : index
    %c0_75 = arith.constant 0 : index
    %c0_76 = arith.constant 0 : index
    %85 = vector.load %arg3[%c0_74, %c22, %c0_75, %c0_76] : memref<1x37x2x128xf32, #tpu.memory_space<vmem>>, vector<1x1x2x128xf32>
    %86 = vector.shape_cast %85 : vector<1x1x2x128xf32> to vector<2x128xf32>
    %87 = arith.maximumf %84, %86 : vector<2x128xf32>
    %c0_77 = arith.constant 0 : index
    %c23 = arith.constant 23 : index
    %c0_78 = arith.constant 0 : index
    %c0_79 = arith.constant 0 : index
    %88 = vector.load %arg3[%c0_77, %c23, %c0_78, %c0_79] : memref<1x37x2x128xf32, #tpu.memory_space<vmem>>, vector<1x1x2x128xf32>
    %89 = vector.shape_cast %88 : vector<1x1x2x128xf32> to vector<2x128xf32>
    %90 = arith.maximumf %87, %89 : vector<2x128xf32>
    %c0_80 = arith.constant 0 : index
    %c24 = arith.constant 24 : index
    %c0_81 = arith.constant 0 : index
    %c0_82 = arith.constant 0 : index
    %91 = vector.load %arg3[%c0_80, %c24, %c0_81, %c0_82] : memref<1x37x2x128xf32, #tpu.memory_space<vmem>>, vector<1x1x2x128xf32>
    %92 = vector.shape_cast %91 : vector<1x1x2x128xf32> to vector<2x128xf32>
    %93 = arith.maximumf %90, %92 : vector<2x128xf32>
    %c0_83 = arith.constant 0 : index
    %c25 = arith.constant 25 : index
    %c0_84 = arith.constant 0 : index
    %c0_85 = arith.constant 0 : index
    %94 = vector.load %arg3[%c0_83, %c25, %c0_84, %c0_85] : memref<1x37x2x128xf32, #tpu.memory_space<vmem>>, vector<1x1x2x128xf32>
    %95 = vector.shape_cast %94 : vector<1x1x2x128xf32> to vector<2x128xf32>
    %96 = arith.maximumf %93, %95 : vector<2x128xf32>
    %c0_86 = arith.constant 0 : index
    %c26 = arith.constant 26 : index
    %c0_87 = arith.constant 0 : index
    %c0_88 = arith.constant 0 : index
    %97 = vector.load %arg3[%c0_86, %c26, %c0_87, %c0_88] : memref<1x37x2x128xf32, #tpu.memory_space<vmem>>, vector<1x1x2x128xf32>
    %98 = vector.shape_cast %97 : vector<1x1x2x128xf32> to vector<2x128xf32>
    %99 = arith.maximumf %96, %98 : vector<2x128xf32>
    %c0_89 = arith.constant 0 : index
    %c27 = arith.constant 27 : index
    %c0_90 = arith.constant 0 : index
    %c0_91 = arith.constant 0 : index
    %100 = vector.load %arg3[%c0_89, %c27, %c0_90, %c0_91] : memref<1x37x2x128xf32, #tpu.memory_space<vmem>>, vector<1x1x2x128xf32>
    %101 = vector.shape_cast %100 : vector<1x1x2x128xf32> to vector<2x128xf32>
    %102 = arith.maximumf %99, %101 : vector<2x128xf32>
    %c0_92 = arith.constant 0 : index
    %c28 = arith.constant 28 : index
    %c0_93 = arith.constant 0 : index
    %c0_94 = arith.constant 0 : index
    %103 = vector.load %arg3[%c0_92, %c28, %c0_93, %c0_94] : memref<1x37x2x128xf32, #tpu.memory_space<vmem>>, vector<1x1x2x128xf32>
    %104 = vector.shape_cast %103 : vector<1x1x2x128xf32> to vector<2x128xf32>
    %105 = arith.maximumf %102, %104 : vector<2x128xf32>
    %c0_95 = arith.constant 0 : index
    %c29 = arith.constant 29 : index
    %c0_96 = arith.constant 0 : index
    %c0_97 = arith.constant 0 : index
    %106 = vector.load %arg3[%c0_95, %c29, %c0_96, %c0_97] : memref<1x37x2x128xf32, #tpu.memory_space<vmem>>, vector<1x1x2x128xf32>
    %107 = vector.shape_cast %106 : vector<1x1x2x128xf32> to vector<2x128xf32>
    %108 = arith.maximumf %105, %107 : vector<2x128xf32>
    %c0_98 = arith.constant 0 : index
    %c30 = arith.constant 30 : index
    %c0_99 = arith.constant 0 : index
    %c0_100 = arith.constant 0 : index
    %109 = vector.load %arg3[%c0_98, %c30, %c0_99, %c0_100] : memref<1x37x2x128xf32, #tpu.memory_space<vmem>>, vector<1x1x2x128xf32>
    %110 = vector.shape_cast %109 : vector<1x1x2x128xf32> to vector<2x128xf32>
    %111 = arith.maximumf %108, %110 : vector<2x128xf32>
    %c0_101 = arith.constant 0 : index
    %c31 = arith.constant 31 : index
    %c0_102 = arith.constant 0 : index
    %c0_103 = arith.constant 0 : index
    %112 = vector.load %arg3[%c0_101, %c31, %c0_102, %c0_103] : memref<1x37x2x128xf32, #tpu.memory_space<vmem>>, vector<1x1x2x128xf32>
    %113 = vector.shape_cast %112 : vector<1x1x2x128xf32> to vector<2x128xf32>
    %114 = arith.maximumf %111, %113 : vector<2x128xf32>
    %c0_104 = arith.constant 0 : index
    %c32 = arith.constant 32 : index
    %c0_105 = arith.constant 0 : index
    %c0_106 = arith.constant 0 : index
    %115 = vector.load %arg3[%c0_104, %c32, %c0_105, %c0_106] : memref<1x37x2x128xf32, #tpu.memory_space<vmem>>, vector<1x1x2x128xf32>
    %116 = vector.shape_cast %115 : vector<1x1x2x128xf32> to vector<2x128xf32>
    %117 = arith.maximumf %114, %116 : vector<2x128xf32>
    %c0_107 = arith.constant 0 : index
    %c33 = arith.constant 33 : index
    %c0_108 = arith.constant 0 : index
    %c0_109 = arith.constant 0 : index
    %118 = vector.load %arg3[%c0_107, %c33, %c0_108, %c0_109] : memref<1x37x2x128xf32, #tpu.memory_space<vmem>>, vector<1x1x2x128xf32>
    %119 = vector.shape_cast %118 : vector<1x1x2x128xf32> to vector<2x128xf32>
    %120 = arith.maximumf %117, %119 : vector<2x128xf32>
    %c0_110 = arith.constant 0 : index
    %c34 = arith.constant 34 : index
    %c0_111 = arith.constant 0 : index
    %c0_112 = arith.constant 0 : index
    %121 = vector.load %arg3[%c0_110, %c34, %c0_111, %c0_112] : memref<1x37x2x128xf32, #tpu.memory_space<vmem>>, vector<1x1x2x128xf32>
    %122 = vector.shape_cast %121 : vector<1x1x2x128xf32> to vector<2x128xf32>
    %123 = arith.maximumf %120, %122 : vector<2x128xf32>
    %c0_113 = arith.constant 0 : index
    %c35 = arith.constant 35 : index
    %c0_114 = arith.constant 0 : index
    %c0_115 = arith.constant 0 : index
    %124 = vector.load %arg3[%c0_113, %c35, %c0_114, %c0_115] : memref<1x37x2x128xf32, #tpu.memory_space<vmem>>, vector<1x1x2x128xf32>
    %125 = vector.shape_cast %124 : vector<1x1x2x128xf32> to vector<2x128xf32>
    %126 = arith.maximumf %123, %125 : vector<2x128xf32>
    %c0_116 = arith.constant 0 : index
    %c36 = arith.constant 36 : index
    %c0_117 = arith.constant 0 : index
    %c0_118 = arith.constant 0 : index
    %127 = vector.load %arg3[%c0_116, %c36, %c0_117, %c0_118] : memref<1x37x2x128xf32, #tpu.memory_space<vmem>>, vector<1x1x2x128xf32>
    %128 = vector.shape_cast %127 : vector<1x1x2x128xf32> to vector<2x128xf32>
    %129 = arith.maximumf %126, %128 : vector<2x128xf32>
    %cst = arith.constant 0.000000e+00 : f32
    %130 = vector.broadcast %cst : f32 to vector<2x128xf32>
    %cst_119 = arith.constant 0.000000e+00 : f32
    %131 = vector.broadcast %cst_119 : f32 to vector<2x128xf32>
    %cst_120 = arith.constant 0.000000e+00 : f32
    %132 = vector.broadcast %cst_120 : f32 to vector<2x128xf32>
    %c0_121 = arith.constant 0 : index
    %c0_122 = arith.constant 0 : index
    %c0_123 = arith.constant 0 : index
    %c0_124 = arith.constant 0 : index
    %133 = vector.load %arg3[%c0_121, %c0_122, %c0_123, %c0_124] : memref<1x37x2x128xf32, #tpu.memory_space<vmem>>, vector<1x1x2x128xf32>
    %134 = vector.shape_cast %133 : vector<1x1x2x128xf32> to vector<2x128xf32>
    %135 = arith.subf %134, %129 : vector<2x128xf32>
    %136 = math.exp %135 : vector<2x128xf32>
    %137 = arith.addf %130, %136 : vector<2x128xf32>
    %c0_i32_125 = arith.constant 0 : i32
    %138 = vector.broadcast %c0_i32_125 : i32 to vector<2x128xi32>
    %139 = arith.cmpi eq, %19, %138 : vector<2x128xi32>
    %140 = arith.select %139, %134, %131 : vector<2x128xi1>, vector<2x128xf32>
    %cst_126 = arith.constant 3.829000e-01 : f32
    %141 = vector.broadcast %cst_126 : f32 to vector<2x128xf32>
    %142 = arith.select %139, %141, %132 : vector<2x128xi1>, vector<2x128xf32>
    %c0_127 = arith.constant 0 : index
    %c1_128 = arith.constant 1 : index
    %c0_129 = arith.constant 0 : index
    %c0_130 = arith.constant 0 : index
    %143 = vector.load %arg3[%c0_127, %c1_128, %c0_129, %c0_130] : memref<1x37x2x128xf32, #tpu.memory_space<vmem>>, vector<1x1x2x128xf32>
    %144 = vector.shape_cast %143 : vector<1x1x2x128xf32> to vector<2x128xf32>
    %145 = arith.subf %144, %129 : vector<2x128xf32>
    %146 = math.exp %145 : vector<2x128xf32>
    %147 = arith.addf %137, %146 : vector<2x128xf32>
    %c1_i32_131 = arith.constant 1 : i32
    %148 = vector.broadcast %c1_i32_131 : i32 to vector<2x128xi32>
    %149 = arith.cmpi eq, %19, %148 : vector<2x128xi32>
    %150 = arith.select %149, %144, %140 : vector<2x128xi1>, vector<2x128xf32>
    %cst_132 = arith.constant 4.524480e-01 : f32
    %151 = vector.broadcast %cst_132 : f32 to vector<2x128xf32>
    %152 = arith.select %149, %151, %142 : vector<2x128xi1>, vector<2x128xf32>
    %c0_133 = arith.constant 0 : index
    %c2_134 = arith.constant 2 : index
    %c0_135 = arith.constant 0 : index
    %c0_136 = arith.constant 0 : index
    %153 = vector.load %arg3[%c0_133, %c2_134, %c0_135, %c0_136] : memref<1x37x2x128xf32, #tpu.memory_space<vmem>>, vector<1x1x2x128xf32>
    %154 = vector.shape_cast %153 : vector<1x1x2x128xf32> to vector<2x128xf32>
    %155 = arith.subf %154, %129 : vector<2x128xf32>
    %156 = math.exp %155 : vector<2x128xf32>
    %157 = arith.addf %147, %156 : vector<2x128xf32>
    %c2_i32_137 = arith.constant 2 : i32
    %158 = vector.broadcast %c2_i32_137 : i32 to vector<2x128xi32>
    %159 = arith.cmpi eq, %19, %158 : vector<2x128xi32>
    %160 = arith.select %159, %154, %150 : vector<2x128xi1>, vector<2x128xf32>
    %cst_138 = arith.constant 6.375840e-01 : f32
    %161 = vector.broadcast %cst_138 : f32 to vector<2x128xf32>
    %162 = arith.select %159, %161, %152 : vector<2x128xi1>, vector<2x128xf32>
    %c0_139 = arith.constant 0 : index
    %c3_140 = arith.constant 3 : index
    %c0_141 = arith.constant 0 : index
    %c0_142 = arith.constant 0 : index
    %163 = vector.load %arg3[%c0_139, %c3_140, %c0_141, %c0_142] : memref<1x37x2x128xf32, #tpu.memory_space<vmem>>, vector<1x1x2x128xf32>
    %164 = vector.shape_cast %163 : vector<1x1x2x128xf32> to vector<2x128xf32>
    %165 = arith.subf %164, %129 : vector<2x128xf32>
    %166 = math.exp %165 : vector<2x128xf32>
    %167 = arith.addf %157, %166 : vector<2x128xf32>
    %c3_i32 = arith.constant 3 : i32
    %168 = vector.broadcast %c3_i32 : i32 to vector<2x128xi32>
    %169 = arith.cmpi eq, %19, %168 : vector<2x128xi32>
    %170 = arith.select %169, %164, %160 : vector<2x128xi1>, vector<2x128xf32>
    %cst_143 = arith.constant 3.774640e-01 : f32
    %171 = vector.broadcast %cst_143 : f32 to vector<2x128xf32>
    %172 = arith.select %169, %171, %162 : vector<2x128xi1>, vector<2x128xf32>
    %c0_144 = arith.constant 0 : index
    %c4_145 = arith.constant 4 : index
    %c0_146 = arith.constant 0 : index
    %c0_147 = arith.constant 0 : index
    %173 = vector.load %arg3[%c0_144, %c4_145, %c0_146, %c0_147] : memref<1x37x2x128xf32, #tpu.memory_space<vmem>>, vector<1x1x2x128xf32>
    %174 = vector.shape_cast %173 : vector<1x1x2x128xf32> to vector<2x128xf32>
    %175 = arith.subf %174, %129 : vector<2x128xf32>
    %176 = math.exp %175 : vector<2x128xf32>
    %177 = arith.addf %167, %176 : vector<2x128xf32>
    %c4_i32 = arith.constant 4 : i32
    %178 = vector.broadcast %c4_i32 : i32 to vector<2x128xi32>
    %179 = arith.cmpi eq, %19, %178 : vector<2x128xi32>
    %180 = arith.select %179, %174, %170 : vector<2x128xi1>, vector<2x128xf32>
    %cst_148 = arith.constant 5.855950e-01 : f32
    %181 = vector.broadcast %cst_148 : f32 to vector<2x128xf32>
    %182 = arith.select %179, %181, %172 : vector<2x128xi1>, vector<2x128xf32>
    %c0_149 = arith.constant 0 : index
    %c5_150 = arith.constant 5 : index
    %c0_151 = arith.constant 0 : index
    %c0_152 = arith.constant 0 : index
    %183 = vector.load %arg3[%c0_149, %c5_150, %c0_151, %c0_152] : memref<1x37x2x128xf32, #tpu.memory_space<vmem>>, vector<1x1x2x128xf32>
    %184 = vector.shape_cast %183 : vector<1x1x2x128xf32> to vector<2x128xf32>
    %185 = arith.subf %184, %129 : vector<2x128xf32>
    %186 = math.exp %185 : vector<2x128xf32>
    %187 = arith.addf %177, %186 : vector<2x128xf32>
    %c5_i32 = arith.constant 5 : i32
    %188 = vector.broadcast %c5_i32 : i32 to vector<2x128xi32>
    %189 = arith.cmpi eq, %19, %188 : vector<2x128xi32>
    %190 = arith.select %189, %184, %180 : vector<2x128xi1>, vector<2x128xf32>
    %cst_153 = arith.constant 4.795740e-01 : f32
    %191 = vector.broadcast %cst_153 : f32 to vector<2x128xf32>
    %192 = arith.select %189, %191, %182 : vector<2x128xi1>, vector<2x128xf32>
    %c0_154 = arith.constant 0 : index
    %c6_155 = arith.constant 6 : index
    %c0_156 = arith.constant 0 : index
    %c0_157 = arith.constant 0 : index
    %193 = vector.load %arg3[%c0_154, %c6_155, %c0_156, %c0_157] : memref<1x37x2x128xf32, #tpu.memory_space<vmem>>, vector<1x1x2x128xf32>
    %194 = vector.shape_cast %193 : vector<1x1x2x128xf32> to vector<2x128xf32>
    %195 = arith.subf %194, %129 : vector<2x128xf32>
    %196 = math.exp %195 : vector<2x128xf32>
    %197 = arith.addf %187, %196 : vector<2x128xf32>
    %c6_i32 = arith.constant 6 : i32
    %198 = vector.broadcast %c6_i32 : i32 to vector<2x128xi32>
    %199 = arith.cmpi eq, %19, %198 : vector<2x128xi32>
    %200 = arith.select %199, %194, %190 : vector<2x128xi1>, vector<2x128xf32>
    %cst_158 = arith.constant 7.815440e-01 : f32
    %201 = vector.broadcast %cst_158 : f32 to vector<2x128xf32>
    %202 = arith.select %199, %201, %192 : vector<2x128xi1>, vector<2x128xf32>
    %c0_159 = arith.constant 0 : index
    %c7_160 = arith.constant 7 : index
    %c0_161 = arith.constant 0 : index
    %c0_162 = arith.constant 0 : index
    %203 = vector.load %arg3[%c0_159, %c7_160, %c0_161, %c0_162] : memref<1x37x2x128xf32, #tpu.memory_space<vmem>>, vector<1x1x2x128xf32>
    %204 = vector.shape_cast %203 : vector<1x1x2x128xf32> to vector<2x128xf32>
    %205 = arith.subf %204, %129 : vector<2x128xf32>
    %206 = math.exp %205 : vector<2x128xf32>
    %207 = arith.addf %197, %206 : vector<2x128xf32>
    %c7_i32 = arith.constant 7 : i32
    %208 = vector.broadcast %c7_i32 : i32 to vector<2x128xi32>
    %209 = arith.cmpi eq, %19, %208 : vector<2x128xi32>
    %210 = arith.select %209, %204, %200 : vector<2x128xi1>, vector<2x128xf32>
    %cst_163 = arith.constant 0.982533991 : f32
    %211 = vector.broadcast %cst_163 : f32 to vector<2x128xf32>
    %212 = arith.select %209, %211, %202 : vector<2x128xi1>, vector<2x128xf32>
    %c0_164 = arith.constant 0 : index
    %c8_165 = arith.constant 8 : index
    %c0_166 = arith.constant 0 : index
    %c0_167 = arith.constant 0 : index
    %213 = vector.load %arg3[%c0_164, %c8_165, %c0_166, %c0_167] : memref<1x37x2x128xf32, #tpu.memory_space<vmem>>, vector<1x1x2x128xf32>
    %214 = vector.shape_cast %213 : vector<1x1x2x128xf32> to vector<2x128xf32>
    %215 = arith.subf %214, %129 : vector<2x128xf32>
    %216 = math.exp %215 : vector<2x128xf32>
    %217 = arith.addf %207, %216 : vector<2x128xf32>
    %c8_i32 = arith.constant 8 : i32
    %218 = vector.broadcast %c8_i32 : i32 to vector<2x128xi32>
    %219 = arith.cmpi eq, %19, %218 : vector<2x128xi32>
    %220 = arith.select %219, %214, %210 : vector<2x128xi1>, vector<2x128xf32>
    %cst_168 = arith.constant 1.01746595 : f32
    %221 = vector.broadcast %cst_168 : f32 to vector<2x128xf32>
    %222 = arith.select %219, %221, %212 : vector<2x128xi1>, vector<2x128xf32>
    %c0_169 = arith.constant 0 : index
    %c9_170 = arith.constant 9 : index
    %c0_171 = arith.constant 0 : index
    %c0_172 = arith.constant 0 : index
    %223 = vector.load %arg3[%c0_169, %c9_170, %c0_171, %c0_172] : memref<1x37x2x128xf32, #tpu.memory_space<vmem>>, vector<1x1x2x128xf32>
    %224 = vector.shape_cast %223 : vector<1x1x2x128xf32> to vector<2x128xf32>
    %225 = arith.subf %224, %129 : vector<2x128xf32>
    %226 = math.exp %225 : vector<2x128xf32>
    %227 = arith.addf %217, %226 : vector<2x128xf32>
    %c9_i32 = arith.constant 9 : i32
    %228 = vector.broadcast %c9_i32 : i32 to vector<2x128xi32>
    %229 = arith.cmpi eq, %19, %228 : vector<2x128xi32>
    %230 = arith.select %229, %224, %220 : vector<2x128xi1>, vector<2x128xf32>
    %cst_173 = arith.constant 6.245810e-01 : f32
    %231 = vector.broadcast %cst_173 : f32 to vector<2x128xf32>
    %232 = arith.select %229, %231, %222 : vector<2x128xi1>, vector<2x128xf32>
    %c0_174 = arith.constant 0 : index
    %c10_175 = arith.constant 10 : index
    %c0_176 = arith.constant 0 : index
    %c0_177 = arith.constant 0 : index
    %233 = vector.load %arg3[%c0_174, %c10_175, %c0_176, %c0_177] : memref<1x37x2x128xf32, #tpu.memory_space<vmem>>, vector<1x1x2x128xf32>
    %234 = vector.shape_cast %233 : vector<1x1x2x128xf32> to vector<2x128xf32>
    %235 = arith.subf %234, %129 : vector<2x128xf32>
    %236 = math.exp %235 : vector<2x128xf32>
    %237 = arith.addf %227, %236 : vector<2x128xf32>
    %c10_i32 = arith.constant 10 : i32
    %238 = vector.broadcast %c10_i32 : i32 to vector<2x128xi32>
    %239 = arith.cmpi eq, %19, %238 : vector<2x128xi32>
    %240 = arith.select %239, %234, %230 : vector<2x128xi1>, vector<2x128xf32>
    %cst_178 = arith.constant 2.58909607 : f32
    %241 = vector.broadcast %cst_178 : f32 to vector<2x128xf32>
    %242 = arith.select %239, %241, %232 : vector<2x128xi1>, vector<2x128xf32>
    %c0_179 = arith.constant 0 : index
    %c11_180 = arith.constant 11 : index
    %c0_181 = arith.constant 0 : index
    %c0_182 = arith.constant 0 : index
    %243 = vector.load %arg3[%c0_179, %c11_180, %c0_181, %c0_182] : memref<1x37x2x128xf32, #tpu.memory_space<vmem>>, vector<1x1x2x128xf32>
    %244 = vector.shape_cast %243 : vector<1x1x2x128xf32> to vector<2x128xf32>
    %245 = arith.subf %244, %129 : vector<2x128xf32>
    %246 = math.exp %245 : vector<2x128xf32>
    %247 = arith.addf %237, %246 : vector<2x128xf32>
    %c11_i32 = arith.constant 11 : i32
    %248 = vector.broadcast %c11_i32 : i32 to vector<2x128xi32>
    %249 = arith.cmpi eq, %19, %248 : vector<2x128xi32>
    %250 = arith.select %249, %244, %240 : vector<2x128xi1>, vector<2x128xf32>
    %cst_183 = arith.constant 9.807940e-01 : f32
    %251 = vector.broadcast %cst_183 : f32 to vector<2x128xf32>
    %252 = arith.select %249, %251, %242 : vector<2x128xi1>, vector<2x128xf32>
    %c0_184 = arith.constant 0 : index
    %c12_185 = arith.constant 12 : index
    %c0_186 = arith.constant 0 : index
    %c0_187 = arith.constant 0 : index
    %253 = vector.load %arg3[%c0_184, %c12_185, %c0_186, %c0_187] : memref<1x37x2x128xf32, #tpu.memory_space<vmem>>, vector<1x1x2x128xf32>
    %254 = vector.shape_cast %253 : vector<1x1x2x128xf32> to vector<2x128xf32>
    %255 = arith.subf %254, %129 : vector<2x128xf32>
    %256 = math.exp %255 : vector<2x128xf32>
    %257 = arith.addf %247, %256 : vector<2x128xf32>
    %c12_i32 = arith.constant 12 : i32
    %258 = vector.broadcast %c12_i32 : i32 to vector<2x128xi32>
    %259 = arith.cmpi eq, %19, %258 : vector<2x128xi32>
    %260 = arith.select %259, %254, %250 : vector<2x128xi1>, vector<2x128xf32>
    %cst_188 = arith.constant 9.203400e-01 : f32
    %261 = vector.broadcast %cst_188 : f32 to vector<2x128xf32>
    %262 = arith.select %259, %261, %252 : vector<2x128xi1>, vector<2x128xf32>
    %c0_189 = arith.constant 0 : index
    %c13_190 = arith.constant 13 : index
    %c0_191 = arith.constant 0 : index
    %c0_192 = arith.constant 0 : index
    %263 = vector.load %arg3[%c0_189, %c13_190, %c0_191, %c0_192] : memref<1x37x2x128xf32, #tpu.memory_space<vmem>>, vector<1x1x2x128xf32>
    %264 = vector.shape_cast %263 : vector<1x1x2x128xf32> to vector<2x128xf32>
    %265 = arith.subf %264, %129 : vector<2x128xf32>
    %266 = math.exp %265 : vector<2x128xf32>
    %267 = arith.addf %257, %266 : vector<2x128xf32>
    %c13_i32 = arith.constant 13 : i32
    %268 = vector.broadcast %c13_i32 : i32 to vector<2x128xi32>
    %269 = arith.cmpi eq, %19, %268 : vector<2x128xi32>
    %270 = arith.select %269, %264, %260 : vector<2x128xi1>, vector<2x128xf32>
    %cst_193 = arith.constant 6.679840e-01 : f32
    %271 = vector.broadcast %cst_193 : f32 to vector<2x128xf32>
    %272 = arith.select %269, %271, %262 : vector<2x128xi1>, vector<2x128xf32>
    %c0_194 = arith.constant 0 : index
    %c14_195 = arith.constant 14 : index
    %c0_196 = arith.constant 0 : index
    %c0_197 = arith.constant 0 : index
    %273 = vector.load %arg3[%c0_194, %c14_195, %c0_196, %c0_197] : memref<1x37x2x128xf32, #tpu.memory_space<vmem>>, vector<1x1x2x128xf32>
    %274 = vector.shape_cast %273 : vector<1x1x2x128xf32> to vector<2x128xf32>
    %275 = arith.subf %274, %129 : vector<2x128xf32>
    %276 = math.exp %275 : vector<2x128xf32>
    %277 = arith.addf %267, %276 : vector<2x128xf32>
    %c14_i32 = arith.constant 14 : i32
    %278 = vector.broadcast %c14_i32 : i32 to vector<2x128xi32>
    %279 = arith.cmpi eq, %19, %278 : vector<2x128xi32>
    %280 = arith.select %279, %274, %270 : vector<2x128xi1>, vector<2x128xf32>
    %cst_198 = arith.constant 1.17229104 : f32
    %281 = vector.broadcast %cst_198 : f32 to vector<2x128xf32>
    %282 = arith.select %279, %281, %272 : vector<2x128xi1>, vector<2x128xf32>
    %c0_199 = arith.constant 0 : index
    %c15_200 = arith.constant 15 : index
    %c0_201 = arith.constant 0 : index
    %c0_202 = arith.constant 0 : index
    %283 = vector.load %arg3[%c0_199, %c15_200, %c0_201, %c0_202] : memref<1x37x2x128xf32, #tpu.memory_space<vmem>>, vector<1x1x2x128xf32>
    %284 = vector.shape_cast %283 : vector<1x1x2x128xf32> to vector<2x128xf32>
    %285 = arith.subf %284, %129 : vector<2x128xf32>
    %286 = math.exp %285 : vector<2x128xf32>
    %287 = arith.addf %277, %286 : vector<2x128xf32>
    %c15_i32 = arith.constant 15 : i32
    %288 = vector.broadcast %c15_i32 : i32 to vector<2x128xi32>
    %289 = arith.cmpi eq, %19, %288 : vector<2x128xi32>
    %290 = arith.select %289, %284, %280 : vector<2x128xi1>, vector<2x128xf32>
    %cst_203 = arith.constant 8.622400e-01 : f32
    %291 = vector.broadcast %cst_203 : f32 to vector<2x128xf32>
    %292 = arith.select %289, %291, %282 : vector<2x128xi1>, vector<2x128xf32>
    %c0_204 = arith.constant 0 : index
    %c16_205 = arith.constant 16 : index
    %c0_206 = arith.constant 0 : index
    %c0_207 = arith.constant 0 : index
    %293 = vector.load %arg3[%c0_204, %c16_205, %c0_206, %c0_207] : memref<1x37x2x128xf32, #tpu.memory_space<vmem>>, vector<1x1x2x128xf32>
    %294 = vector.shape_cast %293 : vector<1x1x2x128xf32> to vector<2x128xf32>
    %295 = arith.subf %294, %129 : vector<2x128xf32>
    %296 = math.exp %295 : vector<2x128xf32>
    %297 = arith.addf %287, %296 : vector<2x128xf32>
    %c16_i32 = arith.constant 16 : i32
    %298 = vector.broadcast %c16_i32 : i32 to vector<2x128xi32>
    %299 = arith.cmpi eq, %19, %298 : vector<2x128xi32>
    %300 = arith.select %299, %294, %290 : vector<2x128xi1>, vector<2x128xf32>
    %cst_208 = arith.constant 9.217140e-01 : f32
    %301 = vector.broadcast %cst_208 : f32 to vector<2x128xf32>
    %302 = arith.select %299, %301, %292 : vector<2x128xi1>, vector<2x128xf32>
    %c0_209 = arith.constant 0 : index
    %c17_210 = arith.constant 17 : index
    %c0_211 = arith.constant 0 : index
    %c0_212 = arith.constant 0 : index
    %303 = vector.load %arg3[%c0_209, %c17_210, %c0_211, %c0_212] : memref<1x37x2x128xf32, #tpu.memory_space<vmem>>, vector<1x1x2x128xf32>
    %304 = vector.shape_cast %303 : vector<1x1x2x128xf32> to vector<2x128xf32>
    %305 = arith.subf %304, %129 : vector<2x128xf32>
    %306 = math.exp %305 : vector<2x128xf32>
    %307 = arith.addf %297, %306 : vector<2x128xf32>
    %c17_i32 = arith.constant 17 : i32
    %308 = vector.broadcast %c17_i32 : i32 to vector<2x128xi32>
    %309 = arith.cmpi eq, %19, %308 : vector<2x128xi32>
    %310 = arith.select %309, %304, %300 : vector<2x128xi1>, vector<2x128xf32>
    %cst_213 = arith.constant 2.15478206 : f32
    %311 = vector.broadcast %cst_213 : f32 to vector<2x128xf32>
    %312 = arith.select %309, %311, %302 : vector<2x128xi1>, vector<2x128xf32>
    %c0_214 = arith.constant 0 : index
    %c18_215 = arith.constant 18 : index
    %c0_216 = arith.constant 0 : index
    %c0_217 = arith.constant 0 : index
    %313 = vector.load %arg3[%c0_214, %c18_215, %c0_216, %c0_217] : memref<1x37x2x128xf32, #tpu.memory_space<vmem>>, vector<1x1x2x128xf32>
    %314 = vector.shape_cast %313 : vector<1x1x2x128xf32> to vector<2x128xf32>
    %315 = arith.subf %314, %129 : vector<2x128xf32>
    %316 = math.exp %315 : vector<2x128xf32>
    %317 = arith.addf %307, %316 : vector<2x128xf32>
    %c18_i32 = arith.constant 18 : i32
    %318 = vector.broadcast %c18_i32 : i32 to vector<2x128xi32>
    %319 = arith.cmpi eq, %19, %318 : vector<2x128xi32>
    %320 = arith.select %319, %314, %310 : vector<2x128xi1>, vector<2x128xf32>
    %cst_218 = arith.constant 1.187832 : f32
    %321 = vector.broadcast %cst_218 : f32 to vector<2x128xf32>
    %322 = arith.select %319, %321, %312 : vector<2x128xi1>, vector<2x128xf32>
    %c0_219 = arith.constant 0 : index
    %c19_220 = arith.constant 19 : index
    %c0_221 = arith.constant 0 : index
    %c0_222 = arith.constant 0 : index
    %323 = vector.load %arg3[%c0_219, %c19_220, %c0_221, %c0_222] : memref<1x37x2x128xf32, #tpu.memory_space<vmem>>, vector<1x1x2x128xf32>
    %324 = vector.shape_cast %323 : vector<1x1x2x128xf32> to vector<2x128xf32>
    %325 = arith.subf %324, %129 : vector<2x128xf32>
    %326 = math.exp %325 : vector<2x128xf32>
    %327 = arith.addf %317, %326 : vector<2x128xf32>
    %c19_i32 = arith.constant 19 : i32
    %328 = vector.broadcast %c19_i32 : i32 to vector<2x128xi32>
    %329 = arith.cmpi eq, %19, %328 : vector<2x128xi32>
    %330 = arith.select %329, %324, %320 : vector<2x128xi1>, vector<2x128xf32>
    %cst_223 = arith.constant 1.17811501 : f32
    %331 = vector.broadcast %cst_223 : f32 to vector<2x128xf32>
    %332 = arith.select %329, %331, %322 : vector<2x128xi1>, vector<2x128xf32>
    %c0_224 = arith.constant 0 : index
    %c20_225 = arith.constant 20 : index
    %c0_226 = arith.constant 0 : index
    %c0_227 = arith.constant 0 : index
    %333 = vector.load %arg3[%c0_224, %c20_225, %c0_226, %c0_227] : memref<1x37x2x128xf32, #tpu.memory_space<vmem>>, vector<1x1x2x128xf32>
    %334 = vector.shape_cast %333 : vector<1x1x2x128xf32> to vector<2x128xf32>
    %335 = arith.subf %334, %129 : vector<2x128xf32>
    %336 = math.exp %335 : vector<2x128xf32>
    %337 = arith.addf %327, %336 : vector<2x128xf32>
    %c20_i32 = arith.constant 20 : i32
    %338 = vector.broadcast %c20_i32 : i32 to vector<2x128xi32>
    %339 = arith.cmpi eq, %19, %338 : vector<2x128xi32>
    %340 = arith.select %339, %334, %330 : vector<2x128xi1>, vector<2x128xf32>
    %cst_228 = arith.constant 1.84854496 : f32
    %341 = vector.broadcast %cst_228 : f32 to vector<2x128xf32>
    %342 = arith.select %339, %341, %332 : vector<2x128xi1>, vector<2x128xf32>
    %c0_229 = arith.constant 0 : index
    %c21_230 = arith.constant 21 : index
    %c0_231 = arith.constant 0 : index
    %c0_232 = arith.constant 0 : index
    %343 = vector.load %arg3[%c0_229, %c21_230, %c0_231, %c0_232] : memref<1x37x2x128xf32, #tpu.memory_space<vmem>>, vector<1x1x2x128xf32>
    %344 = vector.shape_cast %343 : vector<1x1x2x128xf32> to vector<2x128xf32>
    %345 = arith.subf %344, %129 : vector<2x128xf32>
    %346 = math.exp %345 : vector<2x128xf32>
    %347 = arith.addf %337, %346 : vector<2x128xf32>
    %c21_i32 = arith.constant 21 : i32
    %348 = vector.broadcast %c21_i32 : i32 to vector<2x128xi32>
    %349 = arith.cmpi eq, %19, %348 : vector<2x128xi32>
    %350 = arith.select %349, %344, %340 : vector<2x128xi1>, vector<2x128xf32>
    %cst_233 = arith.constant 1.42892206 : f32
    %351 = vector.broadcast %cst_233 : f32 to vector<2x128xf32>
    %352 = arith.select %349, %351, %342 : vector<2x128xi1>, vector<2x128xf32>
    %c0_234 = arith.constant 0 : index
    %c22_235 = arith.constant 22 : index
    %c0_236 = arith.constant 0 : index
    %c0_237 = arith.constant 0 : index
    %353 = vector.load %arg3[%c0_234, %c22_235, %c0_236, %c0_237] : memref<1x37x2x128xf32, #tpu.memory_space<vmem>>, vector<1x1x2x128xf32>
    %354 = vector.shape_cast %353 : vector<1x1x2x128xf32> to vector<2x128xf32>
    %355 = arith.subf %354, %129 : vector<2x128xf32>
    %356 = math.exp %355 : vector<2x128xf32>
    %357 = arith.addf %347, %356 : vector<2x128xf32>
    %c22_i32 = arith.constant 22 : i32
    %358 = vector.broadcast %c22_i32 : i32 to vector<2x128xi32>
    %359 = arith.cmpi eq, %19, %358 : vector<2x128xi32>
    %360 = arith.select %359, %354, %350 : vector<2x128xi1>, vector<2x128xf32>
    %cst_238 = arith.constant 2.84965801 : f32
    %361 = vector.broadcast %cst_238 : f32 to vector<2x128xf32>
    %362 = arith.select %359, %361, %352 : vector<2x128xi1>, vector<2x128xf32>
    %c0_239 = arith.constant 0 : index
    %c23_240 = arith.constant 23 : index
    %c0_241 = arith.constant 0 : index
    %c0_242 = arith.constant 0 : index
    %363 = vector.load %arg3[%c0_239, %c23_240, %c0_241, %c0_242] : memref<1x37x2x128xf32, #tpu.memory_space<vmem>>, vector<1x1x2x128xf32>
    %364 = vector.shape_cast %363 : vector<1x1x2x128xf32> to vector<2x128xf32>
    %365 = arith.subf %364, %129 : vector<2x128xf32>
    %366 = math.exp %365 : vector<2x128xf32>
    %367 = arith.addf %357, %366 : vector<2x128xf32>
    %c23_i32 = arith.constant 23 : i32
    %368 = vector.broadcast %c23_i32 : i32 to vector<2x128xi32>
    %369 = arith.cmpi eq, %19, %368 : vector<2x128xi32>
    %370 = arith.select %369, %364, %360 : vector<2x128xi1>, vector<2x128xf32>
    %cst_243 = arith.constant 7.716050e-01 : f32
    %371 = vector.broadcast %cst_243 : f32 to vector<2x128xf32>
    %372 = arith.select %369, %371, %362 : vector<2x128xi1>, vector<2x128xf32>
    %c0_244 = arith.constant 0 : index
    %c24_245 = arith.constant 24 : index
    %c0_246 = arith.constant 0 : index
    %c0_247 = arith.constant 0 : index
    %373 = vector.load %arg3[%c0_244, %c24_245, %c0_246, %c0_247] : memref<1x37x2x128xf32, #tpu.memory_space<vmem>>, vector<1x1x2x128xf32>
    %374 = vector.shape_cast %373 : vector<1x1x2x128xf32> to vector<2x128xf32>
    %375 = arith.subf %374, %129 : vector<2x128xf32>
    %376 = math.exp %375 : vector<2x128xf32>
    %377 = arith.addf %367, %376 : vector<2x128xf32>
    %c24_i32 = arith.constant 24 : i32
    %378 = vector.broadcast %c24_i32 : i32 to vector<2x128xi32>
    %379 = arith.cmpi eq, %19, %378 : vector<2x128xi32>
    %380 = arith.select %379, %374, %370 : vector<2x128xi1>, vector<2x128xf32>
    %cst_248 = arith.constant 1.65666795 : f32
    %381 = vector.broadcast %cst_248 : f32 to vector<2x128xf32>
    %382 = arith.select %379, %381, %372 : vector<2x128xi1>, vector<2x128xf32>
    %c0_249 = arith.constant 0 : index
    %c25_250 = arith.constant 25 : index
    %c0_251 = arith.constant 0 : index
    %c0_252 = arith.constant 0 : index
    %383 = vector.load %arg3[%c0_249, %c25_250, %c0_251, %c0_252] : memref<1x37x2x128xf32, #tpu.memory_space<vmem>>, vector<1x1x2x128xf32>
    %384 = vector.shape_cast %383 : vector<1x1x2x128xf32> to vector<2x128xf32>
    %385 = arith.subf %384, %129 : vector<2x128xf32>
    %386 = math.exp %385 : vector<2x128xf32>
    %387 = arith.addf %377, %386 : vector<2x128xf32>
    %c25_i32 = arith.constant 25 : i32
    %388 = vector.broadcast %c25_i32 : i32 to vector<2x128xi32>
    %389 = arith.cmpi eq, %19, %388 : vector<2x128xi32>
    %390 = arith.select %389, %384, %380 : vector<2x128xi1>, vector<2x128xf32>
    %cst_253 = arith.constant 4.4835062 : f32
    %391 = vector.broadcast %cst_253 : f32 to vector<2x128xf32>
    %392 = arith.select %389, %391, %382 : vector<2x128xi1>, vector<2x128xf32>
    %c0_254 = arith.constant 0 : index
    %c26_255 = arith.constant 26 : index
    %c0_256 = arith.constant 0 : index
    %c0_257 = arith.constant 0 : index
    %393 = vector.load %arg3[%c0_254, %c26_255, %c0_256, %c0_257] : memref<1x37x2x128xf32, #tpu.memory_space<vmem>>, vector<1x1x2x128xf32>
    %394 = vector.shape_cast %393 : vector<1x1x2x128xf32> to vector<2x128xf32>
    %395 = arith.subf %394, %129 : vector<2x128xf32>
    %396 = math.exp %395 : vector<2x128xf32>
    %397 = arith.addf %387, %396 : vector<2x128xf32>
    %c26_i32 = arith.constant 26 : i32
    %398 = vector.broadcast %c26_i32 : i32 to vector<2x128xi32>
    %399 = arith.cmpi eq, %19, %398 : vector<2x128xi32>
    %400 = arith.select %399, %394, %390 : vector<2x128xi1>, vector<2x128xf32>
    %cst_258 = arith.constant 2.20992208 : f32
    %401 = vector.broadcast %cst_258 : f32 to vector<2x128xf32>
    %402 = arith.select %399, %401, %392 : vector<2x128xi1>, vector<2x128xf32>
    %c0_259 = arith.constant 0 : index
    %c27_260 = arith.constant 27 : index
    %c0_261 = arith.constant 0 : index
    %c0_262 = arith.constant 0 : index
    %403 = vector.load %arg3[%c0_259, %c27_260, %c0_261, %c0_262] : memref<1x37x2x128xf32, #tpu.memory_space<vmem>>, vector<1x1x2x128xf32>
    %404 = vector.shape_cast %403 : vector<1x1x2x128xf32> to vector<2x128xf32>
    %405 = arith.subf %404, %129 : vector<2x128xf32>
    %406 = math.exp %405 : vector<2x128xf32>
    %407 = arith.addf %397, %406 : vector<2x128xf32>
    %c27_i32 = arith.constant 27 : i32
    %408 = vector.broadcast %c27_i32 : i32 to vector<2x128xi32>
    %409 = arith.cmpi eq, %19, %408 : vector<2x128xi32>
    %410 = arith.select %409, %404, %400 : vector<2x128xi1>, vector<2x128xf32>
    %cst_263 = arith.constant 1.120280e+00 : f32
    %411 = vector.broadcast %cst_263 : f32 to vector<2x128xf32>
    %412 = arith.select %409, %411, %402 : vector<2x128xi1>, vector<2x128xf32>
    %c0_264 = arith.constant 0 : index
    %c28_265 = arith.constant 28 : index
    %c0_266 = arith.constant 0 : index
    %c0_267 = arith.constant 0 : index
    %413 = vector.load %arg3[%c0_264, %c28_265, %c0_266, %c0_267] : memref<1x37x2x128xf32, #tpu.memory_space<vmem>>, vector<1x1x2x128xf32>
    %414 = vector.shape_cast %413 : vector<1x1x2x128xf32> to vector<2x128xf32>
    %415 = arith.subf %414, %129 : vector<2x128xf32>
    %416 = math.exp %415 : vector<2x128xf32>
    %417 = arith.addf %407, %416 : vector<2x128xf32>
    %c28_i32 = arith.constant 28 : i32
    %418 = vector.broadcast %c28_i32 : i32 to vector<2x128xi32>
    %419 = arith.cmpi eq, %19, %418 : vector<2x128xi32>
    %420 = arith.select %419, %414, %410 : vector<2x128xi1>, vector<2x128xf32>
    %cst_268 = arith.constant 2.79018211 : f32
    %421 = vector.broadcast %cst_268 : f32 to vector<2x128xf32>
    %422 = arith.select %419, %421, %412 : vector<2x128xi1>, vector<2x128xf32>
    %c0_269 = arith.constant 0 : index
    %c29_270 = arith.constant 29 : index
    %c0_271 = arith.constant 0 : index
    %c0_272 = arith.constant 0 : index
    %423 = vector.load %arg3[%c0_269, %c29_270, %c0_271, %c0_272] : memref<1x37x2x128xf32, #tpu.memory_space<vmem>>, vector<1x1x2x128xf32>
    %424 = vector.shape_cast %423 : vector<1x1x2x128xf32> to vector<2x128xf32>
    %425 = arith.subf %424, %129 : vector<2x128xf32>
    %426 = math.exp %425 : vector<2x128xf32>
    %427 = arith.addf %417, %426 : vector<2x128xf32>
    %c29_i32 = arith.constant 29 : i32
    %428 = vector.broadcast %c29_i32 : i32 to vector<2x128xi32>
    %429 = arith.cmpi eq, %19, %428 : vector<2x128xi32>
    %430 = arith.select %429, %424, %420 : vector<2x128xi1>, vector<2x128xf32>
    %cst_273 = arith.constant 7.065190e-01 : f32
    %431 = vector.broadcast %cst_273 : f32 to vector<2x128xf32>
    %432 = arith.select %429, %431, %422 : vector<2x128xi1>, vector<2x128xf32>
    %c0_274 = arith.constant 0 : index
    %c30_275 = arith.constant 30 : index
    %c0_276 = arith.constant 0 : index
    %c0_277 = arith.constant 0 : index
    %433 = vector.load %arg3[%c0_274, %c30_275, %c0_276, %c0_277] : memref<1x37x2x128xf32, #tpu.memory_space<vmem>>, vector<1x1x2x128xf32>
    %434 = vector.shape_cast %433 : vector<1x1x2x128xf32> to vector<2x128xf32>
    %435 = arith.subf %434, %129 : vector<2x128xf32>
    %436 = math.exp %435 : vector<2x128xf32>
    %437 = arith.addf %427, %436 : vector<2x128xf32>
    %c30_i32 = arith.constant 30 : i32
    %438 = vector.broadcast %c30_i32 : i32 to vector<2x128xi32>
    %439 = arith.cmpi eq, %19, %438 : vector<2x128xi32>
    %440 = arith.select %439, %434, %430 : vector<2x128xi1>, vector<2x128xf32>
    %cst_278 = arith.constant 3.9947679 : f32
    %441 = vector.broadcast %cst_278 : f32 to vector<2x128xf32>
    %442 = arith.select %439, %441, %432 : vector<2x128xi1>, vector<2x128xf32>
    %c0_279 = arith.constant 0 : index
    %c31_280 = arith.constant 31 : index
    %c0_281 = arith.constant 0 : index
    %c0_282 = arith.constant 0 : index
    %443 = vector.load %arg3[%c0_279, %c31_280, %c0_281, %c0_282] : memref<1x37x2x128xf32, #tpu.memory_space<vmem>>, vector<1x1x2x128xf32>
    %444 = vector.shape_cast %443 : vector<1x1x2x128xf32> to vector<2x128xf32>
    %445 = arith.subf %444, %129 : vector<2x128xf32>
    %446 = math.exp %445 : vector<2x128xf32>
    %447 = arith.addf %437, %446 : vector<2x128xf32>
    %c31_i32 = arith.constant 31 : i32
    %448 = vector.broadcast %c31_i32 : i32 to vector<2x128xi32>
    %449 = arith.cmpi eq, %19, %448 : vector<2x128xi32>
    %450 = arith.select %449, %444, %440 : vector<2x128xi1>, vector<2x128xf32>
    %cst_283 = arith.constant 2.22000408 : f32
    %451 = vector.broadcast %cst_283 : f32 to vector<2x128xf32>
    %452 = arith.select %449, %451, %442 : vector<2x128xi1>, vector<2x128xf32>
    %c0_284 = arith.constant 0 : index
    %c32_285 = arith.constant 32 : index
    %c0_286 = arith.constant 0 : index
    %c0_287 = arith.constant 0 : index
    %453 = vector.load %arg3[%c0_284, %c32_285, %c0_286, %c0_287] : memref<1x37x2x128xf32, #tpu.memory_space<vmem>>, vector<1x1x2x128xf32>
    %454 = vector.shape_cast %453 : vector<1x1x2x128xf32> to vector<2x128xf32>
    %455 = arith.subf %454, %129 : vector<2x128xf32>
    %456 = math.exp %455 : vector<2x128xf32>
    %457 = arith.addf %447, %456 : vector<2x128xf32>
    %c32_i32 = arith.constant 32 : i32
    %458 = vector.broadcast %c32_i32 : i32 to vector<2x128xi32>
    %459 = arith.cmpi eq, %19, %458 : vector<2x128xi32>
    %460 = arith.select %459, %454, %450 : vector<2x128xi1>, vector<2x128xf32>
    %cst_288 = arith.constant 9.729340e-01 : f32
    %461 = vector.broadcast %cst_288 : f32 to vector<2x128xf32>
    %462 = arith.select %459, %461, %452 : vector<2x128xi1>, vector<2x128xf32>
    %c0_289 = arith.constant 0 : index
    %c33_290 = arith.constant 33 : index
    %c0_291 = arith.constant 0 : index
    %c0_292 = arith.constant 0 : index
    %463 = vector.load %arg3[%c0_289, %c33_290, %c0_291, %c0_292] : memref<1x37x2x128xf32, #tpu.memory_space<vmem>>, vector<1x1x2x128xf32>
    %464 = vector.shape_cast %463 : vector<1x1x2x128xf32> to vector<2x128xf32>
    %465 = arith.subf %464, %129 : vector<2x128xf32>
    %466 = math.exp %465 : vector<2x128xf32>
    %467 = arith.addf %457, %466 : vector<2x128xf32>
    %c33_i32 = arith.constant 33 : i32
    %468 = vector.broadcast %c33_i32 : i32 to vector<2x128xi32>
    %469 = arith.cmpi eq, %19, %468 : vector<2x128xi32>
    %470 = arith.select %469, %464, %460 : vector<2x128xi1>, vector<2x128xf32>
    %cst_293 = arith.constant 1.48152494 : f32
    %471 = vector.broadcast %cst_293 : f32 to vector<2x128xf32>
    %472 = arith.select %469, %471, %462 : vector<2x128xi1>, vector<2x128xf32>
    %c0_294 = arith.constant 0 : index
    %c34_295 = arith.constant 34 : index
    %c0_296 = arith.constant 0 : index
    %c0_297 = arith.constant 0 : index
    %473 = vector.load %arg3[%c0_294, %c34_295, %c0_296, %c0_297] : memref<1x37x2x128xf32, #tpu.memory_space<vmem>>, vector<1x1x2x128xf32>
    %474 = vector.shape_cast %473 : vector<1x1x2x128xf32> to vector<2x128xf32>
    %475 = arith.subf %474, %129 : vector<2x128xf32>
    %476 = math.exp %475 : vector<2x128xf32>
    %477 = arith.addf %467, %476 : vector<2x128xf32>
    %c34_i32 = arith.constant 34 : i32
    %478 = vector.broadcast %c34_i32 : i32 to vector<2x128xi32>
    %479 = arith.cmpi eq, %19, %478 : vector<2x128xi32>
    %480 = arith.select %479, %474, %470 : vector<2x128xi1>, vector<2x128xf32>
    %cst_298 = arith.constant 5.34247494 : f32
    %481 = vector.broadcast %cst_298 : f32 to vector<2x128xf32>
    %482 = arith.select %479, %481, %472 : vector<2x128xi1>, vector<2x128xf32>
    %c0_299 = arith.constant 0 : index
    %c35_300 = arith.constant 35 : index
    %c0_301 = arith.constant 0 : index
    %c0_302 = arith.constant 0 : index
    %483 = vector.load %arg3[%c0_299, %c35_300, %c0_301, %c0_302] : memref<1x37x2x128xf32, #tpu.memory_space<vmem>>, vector<1x1x2x128xf32>
    %484 = vector.shape_cast %483 : vector<1x1x2x128xf32> to vector<2x128xf32>
    %485 = arith.subf %484, %129 : vector<2x128xf32>
    %486 = math.exp %485 : vector<2x128xf32>
    %487 = arith.addf %477, %486 : vector<2x128xf32>
    %c35_i32 = arith.constant 35 : i32
    %488 = vector.broadcast %c35_i32 : i32 to vector<2x128xi32>
    %489 = arith.cmpi eq, %19, %488 : vector<2x128xi32>
    %490 = arith.select %489, %484, %480 : vector<2x128xi1>, vector<2x128xf32>
    %cst_303 = arith.constant 7.507380e-01 : f32
    %491 = vector.broadcast %cst_303 : f32 to vector<2x128xf32>
    %492 = arith.select %489, %491, %482 : vector<2x128xi1>, vector<2x128xf32>
    %c0_304 = arith.constant 0 : index
    %c36_305 = arith.constant 36 : index
    %c0_306 = arith.constant 0 : index
    %c0_307 = arith.constant 0 : index
    %493 = vector.load %arg3[%c0_304, %c36_305, %c0_306, %c0_307] : memref<1x37x2x128xf32, #tpu.memory_space<vmem>>, vector<1x1x2x128xf32>
    %494 = vector.shape_cast %493 : vector<1x1x2x128xf32> to vector<2x128xf32>
    %495 = arith.subf %494, %129 : vector<2x128xf32>
    %496 = math.exp %495 : vector<2x128xf32>
    %497 = arith.addf %487, %496 : vector<2x128xf32>
    %c36_i32 = arith.constant 36 : i32
    %498 = vector.broadcast %c36_i32 : i32 to vector<2x128xi32>
    %499 = arith.cmpi eq, %19, %498 : vector<2x128xi32>
    %500 = arith.select %499, %494, %490 : vector<2x128xi1>, vector<2x128xf32>
    %cst_308 = arith.constant 4.04077291 : f32
    %501 = vector.broadcast %cst_308 : f32 to vector<2x128xf32>
    %502 = arith.select %499, %501, %492 : vector<2x128xi1>, vector<2x128xf32>
    %503 = math.log %497 : vector<2x128xf32>
    %504 = arith.addf %503, %129 : vector<2x128xf32>
    %c0_309 = arith.constant 0 : index
    %c0_310 = arith.constant 0 : index
    %505 = vector.load %arg7[%c0_309, %c0_310] : memref<2x128xf32, #tpu.memory_space<vmem>>, vector<2x128xf32>
    %506 = arith.subf %504, %500 : vector<2x128xf32>
    %507 = arith.mulf %502, %506 : vector<2x128xf32>
    %cst_311 = arith.constant 0.000000e+00 : f32
    %508 = vector.broadcast %cst_311 : f32 to vector<2x128xf32>
    %509 = arith.select %15, %507, %508 : vector<2x128xi1>, vector<2x128xf32>
    %510 = arith.addf %505, %509 : vector<2x128xf32>
    %c0_312 = arith.constant 0 : index
    %c0_313 = arith.constant 0 : index
    %511 = vector.load %arg7[%c0_312, %c0_313] : memref<2x128xf32, #tpu.memory_space<vmem>>, vector<2x128xf32>
    tpu.vector_store %arg7[%c0_312, %c0_313], %510 {strides = array<i32>} : memref<2x128xf32, #tpu.memory_space<vmem>>, vector<2x128xf32>,
    %c0_314 = arith.constant 0 : index
    %c0_315 = arith.constant 0 : index
    %512 = vector.load %arg8[%c0_314, %c0_315] : memref<2x128xf32, #tpu.memory_space<vmem>>, vector<2x128xf32>
    %513 = arith.extui %15 : vector<2x128xi1> to vector<2x128xi32>
    %514 = arith.sitofp %513 : vector<2x128xi32> to vector<2x128xf32>
    %515 = arith.addf %512, %514 : vector<2x128xf32>
    %c0_316 = arith.constant 0 : index
    %c0_317 = arith.constant 0 : index
    %516 = vector.load %arg8[%c0_316, %c0_317] : memref<2x128xf32, #tpu.memory_space<vmem>>, vector<2x128xf32>
    tpu.vector_store %arg8[%c0_316, %c0_317], %515 {strides = array<i32>} : memref<2x128xf32, #tpu.memory_space<vmem>>, vector<2x128xf32>,
    %c0_i32_318 = arith.constant 0 : i32
    %517 = arith.cmpi eq, %arg2, %c0_i32_318 : i32
    %518 = arith.extui %517 : i1 to i32
    %c0_i32_319 = arith.constant 0 : i32
    %519 = arith.cmpi ne, %518, %c0_i32_319 : i32
    scf.if %519 {
      %c0_320 = arith.constant 0 : index
      %c0_321 = arith.constant 0 : index
      %520 = vector.load %arg7[%c0_320, %c0_321] : memref<2x128xf32, #tpu.memory_space<vmem>>, vector<2x128xf32>
      %521 = vector.shape_cast %520 : vector<2x128xf32> to vector<1x2x128xf32>
      %cst_322 = arith.constant dense<0.000000e+00> : vector<1xf32>
      %522 = vector.multi_reduction <add>, %521, %cst_322 [1, 2] : vector<1x2x128xf32> to vector<1xf32>
      %523 = vector.shape_cast %522 : vector<1xf32> to vector<1x1x1xf32>
      %524 = vector.extract %523[0, 0, 0] : f32 from vector<1x1x1xf32>
      %525 = vector.broadcast %524 : f32 to vector<1x1xf32>
      %526 = vector.shape_cast %525 : vector<1x1xf32> to vector<1x1x1x1xf32>
      %c0_323 = arith.constant 0 : index
      %c0_324 = arith.constant 0 : index
      %c0_325 = arith.constant 0 : index
      %c0_326 = arith.constant 0 : index
      %527 = vector.load %arg5[%c0_323, %c0_324, %c0_325, %c0_326] : memref<1x1x1x1xf32, #tpu.memory_space<vmem>>, vector<1x1x1x1xf32>
      tpu.vector_store %arg5[%c0_323, %c0_324, %c0_325, %c0_326], %526 {strides = array<i32>} : memref<1x1x1x1xf32, #tpu.memory_space<vmem>>, vector<1x1x1x1xf32>,
      %c0_327 = arith.constant 0 : index
      %c0_328 = arith.constant 0 : index
      %528 = vector.load %arg8[%c0_327, %c0_328] : memref<2x128xf32, #tpu.memory_space<vmem>>, vector<2x128xf32>
      %529 = vector.shape_cast %528 : vector<2x128xf32> to vector<1x2x128xf32>
      %cst_329 = arith.constant dense<0.000000e+00> : vector<1xf32>
      %530 = vector.multi_reduction <add>, %529, %cst_329 [1, 2] : vector<1x2x128xf32> to vector<1xf32>
      %531 = vector.shape_cast %530 : vector<1xf32> to vector<1x1x1xf32>
      %532 = vector.extract %531[0, 0, 0] : f32 from vector<1x1x1xf32>
      %533 = vector.broadcast %532 : f32 to vector<1x1xf32>
      %534 = vector.shape_cast %533 : vector<1x1xf32> to vector<1x1x1x1xf32>
      %c0_330 = arith.constant 0 : index
      %c0_331 = arith.constant 0 : index
      %c0_332 = arith.constant 0 : index
      %c0_333 = arith.constant 0 : index
      %535 = vector.load %arg6[%c0_330, %c0_331, %c0_332, %c0_333] : memref<1x1x1x1xf32, #tpu.memory_space<vmem>>, vector<1x1x1x1xf32>
      tpu.vector_store %arg6[%c0_330, %c0_331, %c0_332, %c0_333], %534 {strides = array<i32>} : memref<1x1x1x1xf32, #tpu.memory_space<vmem>>, vector<1x1x1x1xf32>,
    } else {
    }
    return
  }
  func.func @transform_0(%arg0: i32, %arg1: i32, %arg2: i32) -> (i32, i32, i32, i32) {
    %c1_i32 = arith.constant 1 : i32
    %0 = arith.muli %arg1, %c1_i32 : i32
    %1 = arith.addi %0, %arg2 : i32
    %c0_i32 = arith.constant 0 : i32
    %2 = arith.minsi %1, %c0_i32 : i32
    %c0_i32_0 = arith.constant 0 : i32
    %c0_i32_1 = arith.constant 0 : i32
    %c0_i32_2 = arith.constant 0 : i32
    return %arg0, %c0_i32_0, %2, %c0_i32_1 : i32, i32, i32, i32
  }
  func.func @transform_1(%arg0: i32, %arg1: i32, %arg2: i32) -> (i32, i32, i32) {
    %c1_i32 = arith.constant 1 : i32
    %0 = arith.muli %arg1, %c1_i32 : i32
    %1 = arith.addi %0, %arg2 : i32
    %c0_i32 = arith.constant 0 : i32
    %2 = arith.minsi %1, %c0_i32 : i32
    %c0_i32_0 = arith.constant 0 : i32
    %c0_i32_1 = arith.constant 0 : i32
    return %arg0, %2, %c0_i32_0 : i32, i32, i32
  }
  func.func @transform_2(%arg0: i32, %arg1: i32, %arg2: i32) -> (i32, i32, i32, i32) {
    %c0_i32 = arith.constant 0 : i32
    %c0_i32_0 = arith.constant 0 : i32
    %c0_i32_1 = arith.constant 0 : i32
    return %arg0, %arg1, %c0_i32, %c0_i32_0 : i32, i32, i32, i32
  }
  func.func @transform_3(%arg0: i32, %arg1: i32, %arg2: i32) -> (i32, i32, i32, i32) {
    %c0_i32 = arith.constant 0 : i32
    %c0_i32_0 = arith.constant 0 : i32
    %c0_i32_1 = arith.constant 0 : i32
    return %arg0, %arg1, %c0_i32, %c0_i32_0 : i32, i32, i32, i32
  }
}

</mosaic_0001>

<bundles_post_ra>
// kernel: tpu_custom_call.1
= control target key start
LH: loop header
LB: loop body
LE: loop exit
PB: predicated region body
PF: predicated region fallthrough
CT: control target
= control target key end

     0   :  { %9 = vsyncpa [#allocation5], 0  ;;  %s1791_s0 = inlined_call_operand.hbm [shape: f32[2,37,2,128], index: 0, kind: input, shape index: {}]   ;;  %s1792_s1 = inlined_call_operand.hbm [shape: s32[2,2,128], index: 1, kind: input, shape index: {}]   ;;  %s1793_s2 = inlined_call_operand.vmem [shape: f32[2,1,1,1], index: 2, kind: output, shape index: {0}]   ;;  %s1794_s3 = inlined_call_operand.vmem [shape: f32[2,1,1,1], index: 3, kind: output, shape index: {1}]  }
   0x1   :  { %11 = vsyncpa [#allocation5 + $0x1], 0 }
   0x2   :  { %12 = vsyncpa [#allocation7], 0 }
   0x3   :  { %14 = vsyncpa [#allocation7 + $0x1], 0  ;;  %s1202_s12 = smov 0   ;;  %s1204_s13 = smov 0  }
   0x4   :  { %s1206_s14 = smov 0   ;;  %s1208_s15 = smov 0  }
   0x5   :  { %s1210_s16 = smov 0   ;;  %s1212_s17 = smov 0  }
   0x6 LB: > { %s870_s18 = sadd.s32 4294967295, %s1175_s17   ;;  %s39_s19 = sadd.s32 1, %s1171_s16  ;;  %s1175_s17 = sphi %s1212_s17, %s20_s17   ;;  %s1171_s16 = sphi %s1210_s16, %s1848_s16   ;;  %s1167_s15 = sphi %s1208_s15, %s1847_s15   ;;  %s1163_s14 = sphi %s1206_s14, %s1846_s14   ;;  %s1159_s13 = sphi %s1204_s13, %s1845_s13   ;;  %s1155_s12 = sphi %s1202_s12, %s1844_s12  }
   0x7   : > { %p41_p0 = scmp.ge.s32.totalorder %s39_s19, 2  ;;  %s54_s20 = sadd.s32 1, %s1163_s14 }
   0x8   : > { %p61_p1 = scmp.ne.s32.totalorder %s1163_s14, %s1159_s13  ;;  %p62_p2 = scmp.eq.s32.totalorder %s1175_s17, 0 }
   0x9   : > { %s1850_s19 = smov (%p41_p0, %s39_s19), 0  ;;  %p67_p4 = scmp.ne.s32.totalorder %s1159_s13, %s1155_s12 }
   0xa   : > { %p63_p3 = por %p62_p2, %p61_p1  ;;  %s49_s21 = ssub.s32 %s1171_s16, %s1850_s19 }
   0xb   : > { %p68_p5 = scmp.eq.s32.totalorder %s870_s18, 0  ;;  %p52_p6 = scmp.eq.s32.totalorder %s49_s21, 0 }
   0xc   : > { %p937_p8 = scmp.lt.s32.totalorder %s1175_s17, 2  ;;  %s1250_s24 = sand.u32 1, %s1163_s14  }
   0xd   : > { %p1241_p7 = por %p68_p5, %p67_p4  ;;  %s920_s25 = smul.u32 1184, %s1171_s16 }
   0xe   : > { %s1247_s23 = scalar_select %p52_p6, %s1163_s14, %s54_s20  }
   0xf   : > { %s919_s26 = smul.u32 74, %s1250_s24  ;;  %s195_s29 = scalar_lea.hbm %s1791_s0, %s920_s25 }
  0x10   : > { %p1257_p9 = pnand %p937_p8, %p63_p3  ;;  %s182_s6 = scalar_lea.sflag [#allocation5], %s1250_s24 }
  0x11   : > { %s185_s4 = scalar_lea.vmem [#allocation4], %s919_s26  ;;  %s1177_s8 = smov [#allocation4]  }
  0x12   : > { %s196_s5 = sshll.u32 %s185_s4, 4  ;;  %p1067_p10 = pneg %p1257_p9  ;;  %s197_s5 = int_to_ptr.vmem [resolvable:$true] %s196_s5 }
  0x13   : > { %s1078_s7 = scalar_lea.vmem %s197_s5, 1184  ;;  %s1083_s9 = sshll.u32 %s1177_s8, 4  ;;  %s1084_s9 = int_to_ptr.vmem [resolvable:$false] %s1083_s9 }
  0x14   : > { %p1079_p11 = scmp.ne.s32.totalorder %s197_s5, %s1078_s7  ;;  %s1085_s10 = scalar_lea.vmem %s1084_s9, 2368 }
  0x15   : > { %p1086_p0 = scmp.lt.s32.totalorder %s197_s5, %s1084_s9  ;;  %p1087_p1 = scmp.lt.s32.totalorder %s1085_s10, %s1078_s7 }
  0x16   : > { %p1081_p12 = pnand %p1079_p11, %p1067_p10 }
  0x17   : > { %p1088_p2 = por %p1087_p1, %p1086_p0 }
  0x18   : > { %p1082_p13 = pneg %p1081_p12 }
  0x1a   : > { %p1089_p3 = pnand %p1088_p2, %p1082_p13 }
  0x1c   : > { %1092 = shalt.err (!%p1089_p3)
}
  0x1d   : > { %s1178_s11 = smov 32   ;;  %s1179_s12 = smov 2  }
  0x1e   : > { %933 = dma.hbm_to_vmem [thread:$0]  (!%p1257_p9), %s195_s29, 1184, %s197_s5, %s182_s6, %s1178_s11, %s1178_s11, %s1179_s12  }
  0x1f   : > { %p877_p4 = scmp.ge.s32.totalorder %s1175_s17, 1  ;;  %p226_p5 = scmp.lt.s32.totalorder %s1175_s17, 3 }
  0x20   : > { %s875_s18 = sshll.u32 %s1250_s24, 1  ;;  %s876_s21 = sshll.u32 %s1171_s16, 5 }
  0x21   : > { %p1272_p6 = pnand %p877_p4, %p226_p5  ;;  %s210_s25 = scalar_lea.vmem [#allocation6], %s875_s18 }
  0x22   : > { %s221_s26 = sshll.u32 %s210_s25, 4  ;;  %s219_s4 = scalar_lea.hbm %s1792_s1, %s876_s21  ;;  %s222_s26 = int_to_ptr.vmem [resolvable:$true] %s221_s26 }
  0x23   : > { %s207_s7 = scalar_lea.sflag [#allocation7], %s1250_s24  ;;  %s1106_s8 = scalar_lea.vmem %s222_s26, 32 }
  0x24   : > { %p1107_p8 = scmp.ne.s32.totalorder %s222_s26, %s1106_s8  ;;  %s1180_s29 = smov [#allocation6]  }
  0x25   : > { %s1111_s5 = sshll.u32 %s1180_s29, 4  ;;  %s1112_s5 = int_to_ptr.vmem [resolvable:$false] %s1111_s5 }
  0x26   : > { %p1109_p11 = pnand %p1107_p8, %p1067_p10  ;;  %s1113_s6 = scalar_lea.vmem %s1112_s5, 64 }
  0x27   : > { %p1114_p13 = scmp.lt.s32.totalorder %s222_s26, %s1112_s5  ;;  %p1115_p0 = scmp.lt.s32.totalorder %s1113_s6, %s1106_s8 }
  0x28   : > { %p1110_p12 = pneg %p1109_p11 }
  0x29   : > { %p1116_p1 = por %p1115_p0, %p1114_p13 }
  0x2b   : > { %p1117_p2 = pnand %p1116_p1, %p1110_p12 }
  0x2d   : > { %1120 = shalt.err (!%p1117_p2)
}
  0x2e   : > { %936 = dma.hbm_to_vmem [thread:$0]  (!%p1257_p9), %s219_s4, 32, %s222_s26, %s207_s7  }
  0x2f   : > { %230 = sbr.rel (%p1272_p6) target bundleno = 460 (0x1cc), region = 28  ;;  %s232_s24 = sand.u32 (!%p1272_p6), 1, %s1159_s13  }
  0x30   : > { %s921_s9 = smul.u32 (!%p1272_p6), 74, %s232_s24  ;;  %s233_s10 = scalar_lea.sflag (!%p1272_p6), [#allocation5], %s232_s24 }
  0x32   : > { %s1289_s11 = scalar_lea.vmem (!%p1272_p6), [#allocation4], %s921_s9 }
  0x34   : > { %1146 = dma.done.wait (%p1241_p7), %s233_s10, 1184  }
  0x35   : > { %1148 = vsyncadd (%p1241_p7), %s233_s10, 4294966112  ;;  %s878_s12 = sshll.u32 %s232_s24, 1  ;;  %s242_s18 = scalar_lea.sflag [#allocation7], %s232_s24 }
  0x36   : > { %s245_s30 = scalar_lea.vmem [#allocation6], %s878_s12 }
  0x37   : > { %1150 = dma.done.wait (%p1241_p7), %s242_s18, 32  }
  0x38   : > { %1152 = vsyncadd (%p1241_p7), %s242_s18, 4294967264  ;;  %v1181_v0 = vmov 0.0   ;;  %v307_v1 = vlaneseq  ;;  %v1302_v3 = vld [vmem:[%s1289_s11] sm:$0x3]  ;;  %v1305_v4 = vld [vmem:[%s1289_s11 + $0x2] sm:$0x3] }
  0x39   : > { %302 = vst [vmem:[#allocation2] sm:$0x3] %v1181_v0  ;;  %303 = vst [vmem:[#allocation3] sm:$0x3] %v1181_v0  ;;  %v304_v5 = vld [vmem:[%s245_s30] sm:$0x3]  ;;  %v319_v6 = vmax.f32 %v1302_v3, %v1305_v4 }
  0x3a   : > { %v308_v2 = vshrl.u32 %v307_v1, 7  ;;  %v1310_v7 = vld [vmem:[%s1289_s11 + $0x4] sm:$0x3]  ;;  %v1313_v8 = vld [vmem:[%s1289_s11 + $0x6] sm:$0x3]  ;;  %vm312_vm1 = vcmp.gt.s32.totalorder %v304_v5, 0 }
  0x3b   : > { %v322_v9 = vmax.f32 %v319_v6, %v1310_v7  ;;  %v1317_v10 = vld [vmem:[%s1289_s11 + $0x8] sm:$0x3]  ;;  %v879_v12 = vadd.s32 4294967295, %v304_v5  ;;  %v1321_v13 = vld [vmem:[%s1289_s11 + $0xa] sm:$0x3]  ;;  %p286_p7 = scmp.lt.s32.totalorder %s1167_s15, 1 }
  0x3c   : > { %vm311_vm0 = vcmp.lt.s32.totalorder %v308_v2, 2  ;;  %v1329_v16 = vld [vmem:[%s1289_s11 + $0xc] sm:$0x3]  ;;  %v1337_v19 = vld [vmem:[%s1289_s11 + $0xe] sm:$0x3] }
  0x3d   : > { %v325_v11 = vmax.f32 %v322_v9, %v1313_v8  ;;  %vm1323_vm2 = vmand %vm311_vm0, %vm312_vm1  ;;  %v1341_v21 = vld [vmem:[%s1289_s11 + $0x10] sm:$0x3]  ;;  %v1347_v23 = vld [vmem:[%s1289_s11 + $0x12] sm:$0x3]  ;;  %s1852_s15 = smov (!%p286_p7, %s1167_s15), 1 }
  0x3e   : > { %v1334_v18 = vsel %vm1323_vm2, %v879_v12, 0  ;;  %v1360_v27 = vld [vmem:[%s1289_s11 + $0x14] sm:$0x3]  ;;  %v1372_v31 = vld [vmem:[%s1289_s11 + $0x16] sm:$0x3]  ;;  %s291_s21 = scalar_lea.vmem %s1793_s2, %s1852_s15  ;;  %s297_s28 = scalar_lea.vmem %s1794_s3, %s1852_s15 }
  0x3f   : > { %v328_v15 = vmax.f32 %v325_v11, %v1317_v10  ;;  %vm429_vm3 = vcmp.eq.s32.totalorder %v1334_v18, 0  ;;  %vm436_vm4 = vcmp.eq.s32.totalorder %v1334_v18, 1  ;;  %vm443_vm5 = vcmp.eq.s32.totalorder %v1334_v18, 2  ;;  %v1384_v35 = vld [vmem:[%s1289_s11 + $0x18] sm:$0x3] }
  0x40   : > { %v430_v24 = vsel %vm429_vm3, %v1302_v3, 0.0  ;;  %vm450_vm6 = vcmp.eq.s32.totalorder %v1334_v18, 3  ;;  %vm457_vm7 = vcmp.eq.s32.totalorder %v1334_v18, 4  ;;  %vm464_vm8 = vcmp.eq.s32.totalorder %v1334_v18, 5  ;;  %v1396_v39 = vld [vmem:[%s1289_s11 + $0x1a] sm:$0x3] }
  0x41   : > { %v331_v17 = vmax.f32 %v328_v15, %v1321_v13  ;;  %v437_v26 = vsel %vm436_vm4, %v1305_v4, %v430_v24  ;;  %vm471_vm9 = vcmp.eq.s32.totalorder %v1334_v18, 6  ;;  %vm478_vm10 = vcmp.eq.s32.totalorder %v1334_v18, 7  ;;  %v1408_v43 = vld [vmem:[%s1289_s11 + $0x1c] sm:$0x3]  ;;  %v1420_v47 = vld [vmem:[%s1289_s11 + $0x1e] sm:$0x3] }
  0x42   : > { %v444_v28 = vsel %vm443_vm5, %v1310_v7, %v437_v26  ;;  %vm485_vm11 = vcmp.eq.s32.totalorder %v1334_v18, 8  ;;  %vm492_vm12 = vcmp.eq.s32.totalorder %v1334_v18, 9  ;;  %vm1795_vm13 = vcmp.eq.s32.totalorder %v1334_v18, 10  ;;  %v1432_v51 = vld [vmem:[%s1289_s11 + $0x20] sm:$0x3] }
  0x43   : > { %v334_v20 = vmax.f32 %v331_v17, %v1329_v16  ;;  %v451_v30 = vsel %vm450_vm6, %v1313_v8, %v444_v28  ;;  %vm1796_vm14 = vcmp.eq.s32.totalorder %v1334_v18, 11  ;;  %vm1797_vm15 = vcmp.eq.s32.totalorder %v1334_v18, 12  ;;  %v1444_v55 = vld [vmem:[%s1289_s11 + $0x22] sm:$0x3]  ;;  %v1452_v58 = vld [vmem:[%s1289_s11 + $0x24] sm:$0x3] }
  0x44   : > { %v458_v32 = vsel %vm457_vm7, %v1317_v10, %v451_v30  ;;  %vm1798_vm0 = vcmp.eq.s32.totalorder %v1334_v18, 13  ;;  %vm1799_vm1 = vcmp.eq.s32.totalorder %v1334_v18, 14  ;;  %v1459_v60 = vld [vmem:[%s1289_s11 + $0x26] sm:$0x3]  ;;  %v1467_v63 = vld [vmem:[%s1289_s11 + $0x28] sm:$0x3] }
  0x45   : > { %v337_v22 = vmax.f32 %v334_v20, %v1337_v19  ;;  %v465_v34 = vsel %vm464_vm8, %v1321_v13, %v458_v32  ;;  %v1474_v2 = vld [vmem:[%s1289_s11 + $0x2a] sm:$0x3]  ;;  %v1482_v9 = vld [vmem:[%s1289_s11 + $0x2c] sm:$0x3]  ;;  %v1489_v12 = vld [vmem:[%s1289_s11 + $0x2e] sm:$0x3] }
  0x46   : > { %v472_v36 = vsel %vm471_vm9, %v1329_v16, %v465_v34  ;;  %v1497_v20 = vld [vmem:[%s1289_s11 + $0x30] sm:$0x3]  ;;  %v1504_v24 = vld [vmem:[%s1289_s11 + $0x32] sm:$0x3]  ;;  %v1512_v28 = vld [vmem:[%s1289_s11 + $0x34] sm:$0x3] }
  0x47   : > { %v340_v25 = vmax.f32 %v337_v22, %v1341_v21  ;;  %v479_v38 = vsel %vm478_vm10, %v1337_v19, %v472_v36  ;;  %v1519_v30 = vld [vmem:[%s1289_s11 + $0x36] sm:$0x3]  ;;  %v1527_v34 = vld [vmem:[%s1289_s11 + $0x38] sm:$0x3] }
  0x48   : > { %v486_v40 = vsel %vm485_vm11, %v1341_v21, %v479_v38 }
  0x49   : > { %v343_v29 = vmax.f32 %v340_v25, %v1347_v23  ;;  %v493_v42 = vsel %vm492_vm12, %v1347_v23, %v486_v40 }
  0x4a   : > { %v500_v44 = vsel %vm1795_vm13, %v1360_v27, %v493_v42  ;;  %vm1800_vm13 = vcmp.eq.s32.totalorder %v1334_v18, 15 }
  0x4b   : > { %v346_v33 = vmax.f32 %v343_v29, %v1360_v27  ;;  %v507_v46 = vsel %vm1796_vm14, %v1372_v31, %v500_v44  ;;  %vm1801_vm14 = vcmp.eq.s32.totalorder %v1334_v18, 16  ;;  %v1549_v44 = vld [vmem:[%s1289_s11 + $0x3e] sm:$0x3] }
  0x4c   : > { %v514_v48 = vsel %vm1797_vm15, %v1384_v35, %v507_v46  ;;  %vm1802_vm15 = vcmp.eq.s32.totalorder %v1334_v18, 17 }
  0x4d   : > { %v349_v37 = vmax.f32 %v346_v33, %v1372_v31  ;;  %v521_v50 = vsel %vm1798_vm0, %v1396_v39, %v514_v48  ;;  %vm1803_vm0 = vcmp.eq.s32.totalorder %v1334_v18, 18  ;;  %v1557_v48 = vld [vmem:[%s1289_s11 + $0x40] sm:$0x3] }
  0x4e   : > { %v528_v52 = vsel %vm1799_vm1, %v1408_v43, %v521_v50  ;;  %vm1804_vm1 = vcmp.eq.s32.totalorder %v1334_v18, 19  ;;  %v1564_v50 = vld [vmem:[%s1289_s11 + $0x42] sm:$0x3] }
  0x4f   : > { %v352_v41 = vmax.f32 %v349_v37, %v1384_v35  ;;  %v535_v54 = vsel %vm1800_vm13, %v1420_v47, %v528_v52  ;;  %vm1805_vm13 = vcmp.eq.s32.totalorder %v1334_v18, 20  ;;  %v1534_v37 = vld [vmem:[%s1289_s11 + $0x3a] sm:$0x3] }
  0x50   : > { %v542_v56 = vsel %vm1801_vm14, %v1432_v51, %v535_v54  ;;  %vm1806_vm14 = vcmp.eq.s32.totalorder %v1334_v18, 21  ;;  %v1572_v54 = vld [vmem:[%s1289_s11 + $0x44] sm:$0x3] }
  0x51   : > { %v355_v45 = vmax.f32 %v352_v41, %v1396_v39  ;;  %v549_v59 = vsel %vm1802_vm15, %v1444_v55, %v542_v56  ;;  %vm1807_vm15 = vcmp.eq.s32.totalorder %v1334_v18, 22  ;;  %v1542_v41 = vld [vmem:[%s1289_s11 + $0x3c] sm:$0x3] }
  0x52   : > { %v556_v61 = vsel %vm1803_vm0, %v1452_v58, %v549_v59  ;;  %vm1808_vm0 = vcmp.eq.s32.totalorder %v1334_v18, 23 }
  0x53   : > { %v358_v49 = vmax.f32 %v355_v45, %v1408_v43  ;;  %v563_v1 = vsel %vm1804_vm1, %v1459_v60, %v556_v61  ;;  %vm1809_vm1 = vcmp.eq.s32.totalorder %v1334_v18, 24 }
  0x54   : > { %v570_v5 = vsel %vm1805_vm13, %v1467_v63, %v563_v1  ;;  %vm1810_vm13 = vcmp.eq.s32.totalorder %v1334_v18, 25 }
  0x55   : > { %v361_v53 = vmax.f32 %v358_v49, %v1420_v47  ;;  %v577_v11 = vsel %vm1806_vm14, %v1474_v2, %v570_v5  ;;  %vm1811_vm14 = vcmp.eq.s32.totalorder %v1334_v18, 26 }
  0x56   : > { %v584_v15 = vsel %vm1807_vm15, %v1482_v9, %v577_v11  ;;  %vm1812_vm15 = vcmp.eq.s32.totalorder %v1334_v18, 27 }
  0x57   : > { %v364_v57 = vmax.f32 %v361_v53, %v1432_v51  ;;  %v591_v22 = vsel %vm1808_vm0, %v1489_v12, %v584_v15  ;;  %vm1813_vm0 = vcmp.eq.s32.totalorder %v1334_v18, 28 }
  0x58   : > { %v598_v25 = vsel %vm1809_vm1, %v1497_v20, %v591_v22  ;;  %vm1814_vm1 = vcmp.eq.s32.totalorder %v1334_v18, 29 }
  0x59   : > { %v367_v62 = vmax.f32 %v364_v57, %v1444_v55  ;;  %v605_v29 = vsel %vm1810_vm13, %v1504_v24, %v598_v25  ;;  %vm1815_vm13 = vcmp.eq.s32.totalorder %v1334_v18, 30  ;;  %v1579_v57 = vld [vmem:[%s1289_s11 + $0x46] sm:$0x3]  ;;  %v431_v25 = vsel %vm429_vm3, 0.3829, %v1181_v0 }
  0x5a   : > { %v612_v32 = vsel %vm1811_vm14, %v1512_v28, %v605_v29  ;;  %vm1816_vm14 = vcmp.eq.s32.totalorder %v1334_v18, 31  ;;  %v693_v29 = vld [vmem:[#allocation3] sm:$0x3]  ;;  %vm1822_vm3 = vcmp.eq.s32.totalorder %v1334_v18, 10 }
  0x5b   : > { %v370_v6 = vmax.f32 %v367_v62, %v1452_v58  ;;  %v619_v36 = vsel %vm1812_vm15, %v1519_v30, %v612_v32  ;;  %vm653_vm15 = vcmp.eq.s32.totalorder %v1334_v18, 32  ;;  %v1586_v62 = vld [vmem:[%s1289_s11 + $0x48] sm:$0x3]  ;;  %v916_v32 = vsel %vm1323_vm2, 1.0, %v1181_v0 }
  0x5c   : > { %v626_v38 = vsel %vm1813_vm0, %v1527_v34, %v619_v36  ;;  %vm660_vm0 = vcmp.eq.s32.totalorder %v1334_v18, 33  ;;  %v438_v36 = vsel %vm436_vm4, 0.452448, %v431_v25  ;;  %vm1823_vm4 = vcmp.eq.s32.totalorder %v1334_v18, 11 }
  0x5d   : > { %v373_v17 = vmax.f32 %v370_v6, %v1459_v60  ;;  %v633_v42 = vsel %vm1814_vm1, %v1534_v37, %v626_v38  ;;  %vm667_vm1 = vcmp.eq.s32.totalorder %v1334_v18, 34  ;;  %v696_v38 = vadd.f32 %v916_v32, %v693_v29 }
  0x5e   : > { %v640_v45 = vsel %vm1815_vm13, %v1542_v41, %v633_v42  ;;  %vm674_vm13 = vcmp.eq.s32.totalorder %v1334_v18, 35  ;;  %v445_v42 = vsel %vm443_vm5, 0.637584, %v438_v36  ;;  %vm1824_vm5 = vcmp.eq.s32.totalorder %v1334_v18, 12 }
  0x5f   : > { %v376_v26 = vmax.f32 %v373_v17, %v1467_v63  ;;  %v647_v49 = vsel %vm1816_vm14, %v1549_v44, %v640_v45  ;;  %vm681_vm14 = vcmp.eq.s32.totalorder %v1334_v18, 36  ;;  %697 = vst [vmem:[#allocation3] sm:$0x3] %v696_v38 }
  0x60   : > { %v654_v52 = vsel %vm653_vm15, %v1557_v48, %v647_v49  ;;  %v452_v49 = vsel %vm450_vm6, 0.377464, %v445_v42  ;;  %vm1825_vm6 = vcmp.eq.s32.totalorder %v1334_v18, 13 }
  0x61   : > { %v379_v33 = vmax.f32 %v376_v26, %v1474_v2  ;;  %v661_v56 = vsel %vm660_vm0, %v1564_v50, %v654_v52  ;;  %v459_v52 = vsel %vm457_vm7, 0.585595, %v452_v49  ;;  %vm1826_vm7 = vcmp.eq.s32.totalorder %v1334_v18, 14 }
  0x62   : > { %v668_v59 = vsel %vm667_vm1, %v1572_v54, %v661_v56 }
  0x63   : > { %v382_v40 = vmax.f32 %v379_v33, %v1482_v9  ;;  %v675_v1 = vsel %vm674_vm13, %v1579_v57, %v668_v59 }
  0x64   : > { %v1594_v5 = vsel %vm681_vm14, %v1586_v62, %v675_v1 }
  0x65   : > { %v385_v46 = vmax.f32 %v382_v40, %v1489_v12 }
  0x67   : > { %v388_v53 = vmax.f32 %v385_v46, %v1497_v20 }
  0x69   : > { %v391_v61 = vmax.f32 %v388_v53, %v1504_v24 }
  0x6b   : > { %v394_v6 = vmax.f32 %v391_v61, %v1512_v28 }
  0x6d   : > { %v397_v11 = vmax.f32 %v394_v6, %v1519_v30 }
  0x6f   : > { %v400_v15 = vmax.f32 %v397_v11, %v1527_v34 }
  0x71   : > { %v403_v17 = vmax.f32 %v400_v15, %v1534_v37 }
  0x73   : > { %v406_v22 = vmax.f32 %v403_v17, %v1542_v41 }
  0x75   : > { %v409_v26 = vmax.f32 %v406_v22, %v1549_v44 }
  0x77   : > { %v412_v33 = vmax.f32 %v409_v26, %v1557_v48 }
  0x79   : > { %v415_v40 = vmax.f32 %v412_v33, %v1564_v50 }
  0x7b   : > { %v418_v45 = vmax.f32 %v415_v40, %v1572_v54 }
  0x7d   : > { %v421_v46 = vmax.f32 %v418_v45, %v1579_v57 }
  0x7f   : > { %v1619_v0 = vmax.f32 %v421_v46, %v1586_v62 }
  0x81   : > { %v425_v53 = vsub.f32 %v1302_v3, %v1619_v0  ;;  %v432_v56 = vsub.f32 %v1305_v4, %v1619_v0  ;;  %v439_v59 = vsub.f32 %v1310_v7, %v1619_v0  ;;  %v446_v61 = vsub.f32 %v1313_v8, %v1619_v0 }
  0x82   : > { %v453_v1 = vsub.f32 %v1317_v10, %v1619_v0  ;;  %v460_v22 = vsub.f32 %v1321_v13, %v1619_v0  ;;  %v466_v3 = vsel %vm464_vm8, 0.479574, %v459_v52  ;;  %v467_v7 = vsub.f32 %v1329_v16, %v1619_v0 }
  0x83   : > { %v426_v6 = vmul.f32 1.442695, %v425_v53  ;;  %v433_v11 = vmul.f32 1.442695, %v432_v56  ;;  %v440_v15 = vmul.f32 1.442695, %v439_v59  ;;  %v474_v25 = vsub.f32 %v1337_v19, %v1619_v0 }
  0x84   : > { %v447_v17 = vmul.f32 1.442695, %v446_v61  ;;  %v454_v4 = vmul.f32 1.442695, %v453_v1  ;;  %v473_v8 = vsel %vm471_vm9, 0.781544, %v466_v3  ;;  %v481_v29 = vsub.f32 %v1341_v21, %v1619_v0 }
  0x85   : > { %989 = vpow2.f32 %v426_v6  ;;  %v461_v10 = vmul.f32 1.442695, %v460_v22  ;;  %v468_v13 = vmul.f32 1.442695, %v467_v7  ;;  %v480_v26 = vsel %vm478_vm10, 0.982534, %v473_v8 }
  0x86   : > { %991 = vpow2.f32 %v433_v11  ;;  %v475_v32 = vmul.f32 1.442695, %v474_v25  ;;  %v488_v16 = vsub.f32 %v1347_v23, %v1619_v0  ;;  %v487_v33 = vsel %vm485_vm11, 1.017466, %v480_v26 }
  0x87   : > { %993 = vpow2.f32 %v440_v15  ;;  %v482_v36 = vmul.f32 1.442695, %v481_v29  ;;  %v495_v19 = vsub.f32 %v1360_v27, %v1619_v0  ;;  %v494_v40 = vsel %vm492_vm12, 0.624581, %v487_v33 }
  0x88   : > { %995 = vpow2.f32 %v447_v17  ;;  %v489_v38 = vmul.f32 1.442695, %v488_v16  ;;  %v502_v21 = vsub.f32 %v1372_v31, %v1619_v0  ;;  %v509_v23 = vsub.f32 %v1384_v35, %v1619_v0 }
  0x89   : > { %997 = vpow2.f32 %v454_v4  ;;  %v496_v45 = vmul.f32 1.442695, %v495_v19  ;;  %v501_v49 = vsel %vm1822_vm3, 2.589096, %v494_v40  ;;  %v516_v56 = vsub.f32 %v1396_v39, %v1619_v0 }
  0x8a   : > { %999 = vpow2.f32 %v461_v10  ;;  %v503_v53 = vmul.f32 1.442695, %v502_v21  ;;  %v510_v31 = vmul.f32 1.442695, %v509_v23  ;;  %v523_v1 = vsub.f32 %v1408_v43, %v1619_v0 }
  0x8b   : > { %1001 = vpow2.f32 %v468_v13  ;;  %v508_v35 = vsel %vm1823_vm4, 0.980794, %v501_v49  ;;  %v517_v15 = vmul.f32 1.442695, %v516_v56  ;;  %v530_v17 = vsub.f32 %v1420_v47, %v1619_v0 }
  0x8c   : > { %1003 = vpow2.f32 %v475_v32  ;;  %v524_v39 = vmul.f32 1.442695, %v523_v1  ;;  %v537_v4 = vsub.f32 %v1432_v51, %v1619_v0  ;;  %v515_v43 = vsel %vm1824_vm5, 0.92034, %v508_v35 }
  0x8d   : > { %1005 = vpow2.f32 %v482_v36  ;;  %v531_v10 = vmul.f32 1.442695, %v530_v17  ;;  %v544_v25 = vsub.f32 %v1444_v55, %v1619_v0  ;;  %v551_v29 = vsub.f32 %v1452_v58, %v1619_v0 }
  0x8e   : > { %1007 = vpow2.f32 %v489_v38  ;;  %v538_v47 = vmul.f32 1.442695, %v537_v4  ;;  %v522_v51 = vsel %vm1825_vm6, 0.667984, %v515_v43  ;;  %v558_v36 = vsub.f32 %v1459_v60, %v1619_v0 }
  0x8f   : > { %1009 = vpow2.f32 %v496_v45  ;;  %v545_v33 = vmul.f32 1.442695, %v544_v25  ;;  %v552_v55 = vmul.f32 1.442695, %v551_v29  ;;  %v565_v40 = vsub.f32 %v1467_v63, %v1619_v0 }
  0x90   : > { %1011 = vpow2.f32 %v503_v53  ;;  %v529_v58 = vsel %vm1826_vm7, 1.172291, %v522_v51  ;;  %v559_v45 = vmul.f32 1.442695, %v558_v36  ;;  %v572_v23 = vsub.f32 %v1474_v2, %v1619_v0 }
  0x91   : > { %1013 = vpow2.f32 %v510_v31  ;;  %v566_v60 = vmul.f32 1.442695, %v565_v40  ;;  %vm1827_vm8 = vcmp.eq.s32.totalorder %v1334_v18, 15  ;;  %v593_v1 = vsub.f32 %v1497_v20, %v1619_v0 }
  0x92   : > { %v990_v42 = vpop.eup %989  ;;  %1015 = vpow2.f32 %v517_v15  ;;  %v536_v63 = vsel %vm1827_vm8, 0.86224, %v529_v58  ;;  %v573_v56 = vmul.f32 1.442695, %v572_v23  ;;  %vm1828_vm9 = vcmp.eq.s32.totalorder %v1334_v18, 16 }
  0x93   : > { %v992_v46 = vpop.eup %991  ;;  %1017 = vpow2.f32 %v524_v39  ;;  %v600_v15 = vsub.f32 %v1504_v24, %v1619_v0  ;;  %vm1829_vm10 = vcmp.eq.s32.totalorder %v1334_v18, 17  ;;  %v614_v43 = vsub.f32 %v1519_v30, %v1619_v0 }
  0x94   : > { %v994_v52 = vpop.eup %993  ;;  %v435_v27 = vadd.f32 %v992_v46, %v990_v42  ;;  %1019 = vpow2.f32 %v531_v10  ;;  %v621_v25 = vsub.f32 %v1527_v34, %v1619_v0  ;;  %vm1830_vm11 = vcmp.eq.s32.totalorder %v1334_v18, 18 }
  0x95   : > { %v996_v59 = vpop.eup %995  ;;  %1021 = vpow2.f32 %v538_v47  ;;  %v615_v47 = vmul.f32 1.442695, %v614_v43  ;;  %v628_v29 = vsub.f32 %v1534_v37, %v1619_v0  ;;  %vm1831_vm12 = vcmp.eq.s32.totalorder %v1334_v18, 19 }
  0x96   : > { %v442_v61 = vadd.f32 %v994_v52, %v435_v27  ;;  %v998_v6 = vpop.eup %997  ;;  %1023 = vpow2.f32 %v545_v33  ;;  %v579_v52 = vsub.f32 %v1482_v9, %v1619_v0  ;;  %v543_v9 = vsel %vm1828_vm9, 0.921714, %v536_v63 }
  0x97   : > { %v1000_v22 = vpop.eup %999  ;;  %1025 = vpow2.f32 %v552_v55  ;;  %v550_v20 = vsel %vm1829_vm10, 2.154782, %v543_v9  ;;  %v622_v30 = vmul.f32 1.442695, %v621_v25  ;;  %vm1832_vm3 = vcmp.eq.s32.totalorder %v1334_v18, 20 }
  0x98   : > { %v449_v11 = vadd.f32 %v996_v59, %v442_v61  ;;  %v1002_v7 = vpop.eup %1001  ;;  %1027 = vpow2.f32 %v559_v45  ;;  %v586_v59 = vsub.f32 %v1489_v12, %v1619_v0  ;;  %v580_v2 = vmul.f32 1.442695, %v579_v52 }
  0x99   : > { %v1004_v13 = vpop.eup %1003  ;;  %1029 = vpow2.f32 %v566_v60  ;;  %v594_v12 = vmul.f32 1.442695, %v593_v1  ;;  %v656_v23 = vsub.f32 %v1564_v50, %v1619_v0  ;;  %v663_v60 = vsub.f32 %v1572_v54, %v1619_v0 }
  0x9a   : > { %v456_v3 = vadd.f32 %v998_v6, %v449_v11  ;;  %v1006_v32 = vpop.eup %1005  ;;  %1031 = vpow2.f32 %v573_v56  ;;  %v587_v11 = vmul.f32 1.442695, %v586_v59  ;;  %vm1833_vm4 = vcmp.eq.s32.totalorder %v1334_v18, 21 }
  0x9b   : > { %v1008_v19 = vpop.eup %1007  ;;  %1033 = vpow2.f32 %v580_v2  ;;  %v657_v63 = vmul.f32 1.442695, %v656_v23  ;;  %v664_v50 = vmul.f32 1.442695, %v663_v60  ;;  %vm1834_vm5 = vcmp.eq.s32.totalorder %v1334_v18, 22 }
  0x9c   : > { %v463_v8 = vadd.f32 %v1000_v22, %v456_v3  ;;  %v1010_v21 = vpop.eup %1009  ;;  %v607_v3 = vsub.f32 %v1512_v28, %v1619_v0  ;;  %1035 = vpow2.f32 %v587_v11  ;;  %v557_v28 = vsel %vm1830_vm11, 1.187832, %v550_v20 }
  0x9d   : > { %v1012_v46 = vpop.eup %1011  ;;  %1037 = vpow2.f32 %v594_v12  ;;  %v564_v34 = vsel %vm1831_vm12, 1.178115, %v557_v28  ;;  %vm1835_vm6 = vcmp.eq.s32.totalorder %v1334_v18, 23  ;;  %vm1836_vm7 = vcmp.eq.s32.totalorder %v1334_v18, 24 }
  0x9e   : > { %v470_v26 = vadd.f32 %v1002_v7, %v463_v8  ;;  %v1014_v27 = vpop.eup %1013  ;;  %v601_v7 = vmul.f32 1.442695, %v600_v15  ;;  %v608_v24 = vmul.f32 1.442695, %v607_v3  ;;  %vm1837_vm8 = vcmp.eq.s32.totalorder %v1334_v18, 25 }
  0x9f   : > { %v1016_v61 = vpop.eup %1015  ;;  %vm1838_vm9 = vcmp.eq.s32.totalorder %v1334_v18, 26  ;;  %vm1839_vm10 = vcmp.eq.s32.totalorder %v1334_v18, 27  ;;  %vm1840_vm11 = vcmp.eq.s32.totalorder %v1334_v18, 28  ;;  %vm1841_vm12 = vcmp.eq.s32.totalorder %v1334_v18, 29 }
  0xa0   : > { %v477_v16 = vadd.f32 %v1004_v13, %v470_v26  ;;  %v1018_v6 = vpop.eup %1017  ;;  %1039 = vpow2.f32 %v601_v7 }
  0xa1   : > { %v1020_v17 = vpop.eup %1019  ;;  %1041 = vpow2.f32 %v608_v24 }
  0xa2   : > { %v484_v38 = vadd.f32 %v1006_v32, %v477_v16  ;;  %v1022_v39 = vpop.eup %1021  ;;  %v635_v16 = vsub.f32 %v1542_v41, %v1619_v0  ;;  %1043 = vpow2.f32 %v615_v47  ;;  %v571_v41 = vsel %vm1832_vm3, 1.848545, %v564_v34 }
  0xa3   : > { %v1024_v8 = vpop.eup %1023  ;;  %1045 = vpow2.f32 %v622_v30  ;;  %vm1842_vm3 = vcmp.eq.s32.totalorder %v1334_v18, 30 }
  0xa4   : > { %v491_v42 = vadd.f32 %v1008_v19, %v484_v38  ;;  %v1026_v13 = vpop.eup %1025  ;;  %v629_v19 = vmul.f32 1.442695, %v628_v29  ;;  %v642_v38 = vsub.f32 %v1549_v44, %v1619_v0  ;;  %v636_v37 = vmul.f32 1.442695, %v635_v16 }
  0xa5   : > { %v1028_v32 = vpop.eup %1027 }
  0xa6   : > { %v498_v49 = vadd.f32 %v1010_v21, %v491_v42  ;;  %v1030_v33 = vpop.eup %1029  ;;  %v649_v21 = vsub.f32 %v1557_v48, %v1619_v0  ;;  %1047 = vpow2.f32 %v629_v19  ;;  %v643_v45 = vmul.f32 1.442695, %v642_v38 }
  0xa7   : > { %v1032_v55 = vpop.eup %1031  ;;  %1049 = vpow2.f32 %v636_v37  ;;  %v578_v48 = vsel %vm1833_vm4, 1.428922, %v571_v41  ;;  %vm1843_vm4 = vcmp.eq.s32.totalorder %v1334_v18, 31 }
  0xa8   : > { %v505_v53 = vadd.f32 %v1012_v46, %v498_v49  ;;  %v1034_v58 = vpop.eup %1033  ;;  %v650_v44 = vmul.f32 1.442695, %v649_v21  ;;  %1051 = vpow2.f32 %v643_v45  ;;  %v585_v54 = vsel %vm1834_vm5, 2.849658, %v578_v48 }
  0xa9   : > { %v1036_v46 = vpop.eup %1035  ;;  %v592_v9 = vsel %vm1835_vm6, 0.771605, %v585_v54 }
  0xaa   : > { %v512_v31 = vadd.f32 %v1014_v27, %v505_v53  ;;  %v1038_v52 = vpop.eup %1037  ;;  %v670_v53 = vsub.f32 %v1579_v57, %v1619_v0  ;;  %1053 = vpow2.f32 %v650_v44  ;;  %v716_v44 = vld [vmem:[#allocation3] sm:$0x3] }
  0xab   : > { %1055 = vpow2.f32 %v657_v63 }
  0xac   : > { %v519_v35 = vadd.f32 %v1016_v61, %v512_v31  ;;  %v677_v61 = vsub.f32 %v1586_v62, %v1619_v0  ;;  %v671_v1 = vmul.f32 1.442695, %v670_v53  ;;  %1057 = vpow2.f32 %v664_v50 }
  0xad   : > { %v1040_v56 = vpop.eup %1039  ;;  %v599_v62 = vsel %vm1836_vm7, 1.656668, %v592_v9 }
  0xae   : > { %v526_v22 = vadd.f32 %v1018_v6, %v519_v35  ;;  %v1042_v31 = vpop.eup %1041  ;;  %v678_v57 = vmul.f32 1.442695, %v677_v61  ;;  %1059 = vpow2.f32 %v671_v1  ;;  %v606_v3 = vsel %vm1837_vm8, 4.483506, %v599_v62 }
  0xaf   : > { %v1044_v6 = vpop.eup %1043  ;;  %v613_v43 = vsel %vm1838_vm9, 2.209922, %v606_v3 }
  0xb0   : > { %v533_v4 = vadd.f32 %v1020_v17, %v526_v22  ;;  %v1046_v11 = vpop.eup %1045  ;;  %1061 = vpow2.f32 %v678_v57  ;;  %v620_v24 = vsel %vm1839_vm10, 1.12028, %v613_v43 }
  0xb1   : > { %v627_v47 = vsel %vm1840_vm11, 2.790182, %v620_v24 }
  0xb2   : > { %v540_v10 = vadd.f32 %v1022_v39, %v533_v4 }
  0xb3   : > { %v1048_v17 = vpop.eup %1047 }
  0xb4   : > { %v547_v26 = vadd.f32 %v1024_v8, %v540_v10  ;;  %v1050_v12 = vpop.eup %1049 }
  0xb5   : > { %v1052_v20 = vpop.eup %1051 }
  0xb6   : > { %v554_v51 = vadd.f32 %v1026_v13, %v547_v26 }
  0xb7   : > { %v1054_v7 = vpop.eup %1053 }
  0xb8   : > { %v561_v36 = vadd.f32 %v1028_v32, %v554_v51  ;;  %v1056_v10 = vpop.eup %1055  ;;  %v634_v51 = vsel %vm1841_vm12, 0.706519, %v627_v47 }
  0xb9   : > { %v1058_v13 = vpop.eup %1057 }
  0xba   : > { %v568_v40 = vadd.f32 %v1030_v33, %v561_v36  ;;  %v641_v33 = vsel %vm1842_vm3, 3.994768, %v634_v51 }
  0xbb   : > { %v1060_v26 = vpop.eup %1059  ;;  %v648_v34 = vsel %vm1843_vm4, 2.220004, %v641_v33 }
  0xbc   : > { %v575_v42 = vadd.f32 %v1032_v55, %v568_v40  ;;  %v655_v36 = vsel %vm653_vm15, 0.972934, %v648_v34  ;;  %vm702_vm15 = vcmask 1041408  }
  0xbd   : > { %v1062_v32 = vpop.eup %1061  ;;  %v662_v19 = vsel %vm660_vm0, 1.481525, %v655_v36 }
  0xbe   : > { %v582_v49 = vadd.f32 %v1034_v58, %v575_v42  ;;  %v669_v38 = vsel %vm667_vm1, 5.342475, %v662_v19  ;;  %v687_v42 = vld [vmem:[#allocation2] sm:$0x3] }
  0xbf   : > { %v676_v40 = vsel %vm674_vm13, 0.750738, %v669_v38 }
  0xc0   : > { %v589_v27 = vadd.f32 %v1036_v46, %v582_v49  ;;  %v683_v58 = vsel %vm681_vm14, 4.040773, %v676_v40 }
  0xc2   : > { %v596_v59 = vadd.f32 %v1038_v52, %v589_v27  ;;  %v717_v52 = vsel %vm702_vm15, %v716_v44, 0.0 }
  0xc4   : > { %v603_v2 = vadd.f32 %v1040_v56, %v596_v59 }
  0xc6   : > { %v610_v35 = vadd.f32 %v1042_v31, %v603_v2 }
  0xc8   : > { %v617_v15 = vadd.f32 %v1044_v6, %v610_v35 }
  0xca   : > { %v624_v22 = vadd.f32 %v1046_v11, %v617_v15 }
  0xcc   : > { %v631_v39 = vadd.f32 %v1048_v17, %v624_v22 }
  0xce   : > { %v638_v4 = vadd.f32 %v1050_v12, %v631_v39 }
  0xd0   : > { %v645_v8 = vadd.f32 %v1052_v20, %v638_v4 }
  0xd2   : > { %v652_v25 = vadd.f32 %v1054_v7, %v645_v8 }
  0xd4   : > { %v659_v28 = vadd.f32 %v1056_v10, %v652_v25 }
  0xd6   : > { %v666_v29 = vadd.f32 %v1058_v13, %v659_v28 }
  0xd8   : > { %v673_v30 = vadd.f32 %v1060_v26, %v666_v29 }
  0xda   : > { %v680_v16 = vadd.f32 %v1062_v32, %v673_v30 }
  0xdc   : > { %1063 = vlog2.f32 %v680_v16 }
  0xe9   : > { %v1064_v55 = vpop.eup %1063 }
  0xea   : > { %v685_v37 = vmul.f32 0.6931472, %v1064_v55 }
  0xec   : > { %v686_v21 = vadd.f32 %v685_v37, %v1619_v0 }
  0xee   : > { %v688_v41 = vsub.f32 %v686_v21, %v1594_v5 }
  0xf0   : > { %v689_v45 = vmul.f32 %v688_v41, %v683_v58 }
  0xf2   : > { %v690_v23 = vsel %vm1323_vm2, %v689_v45, 0.0  ;;  %vm714_vm2 = vcmask 0  }
  0xf3   : > { %v691_v46 = vadd.f32 %v690_v23, %v687_v42 }
  0xf5   : > { %692 = vst [vmem:[#allocation2] sm:$0x3] %v691_v46 }
  0xfc   : > { %v701_v49 = vld [vmem:[#allocation2] sm:$0x3] }
  0xfd   : > { %v703_v60 = vsel %vm702_vm15, %v701_v49, 0.0 }
  0xfe   : > { %704 = vadd.xlane.f32.xlu0 %v703_v60 }
 0x102   : > { %718 = vadd.xlane.f32.xlu0 %v717_v52 }
 0x187   : > { %v705_v0 = vpop.xlane.xlu0 %704 }
 0x188   : > { %v706_v18 = vrot.slane %v705_v0, 4 }
 0x18a   : > { %v707_v48 = vadd.f32 %v706_v18, %v705_v0 }
 0x18b   : > { %v719_v5 = vpop.xlane.xlu0 %718 }
 0x18c   : > { %v708_v27 = vrot.slane %v707_v48, 2  ;;  %v720_v63 = vrot.slane %v719_v5, 4 }
 0x18e   : > { %v721_v53 = vadd.f32 %v720_v63, %v719_v5  ;;  %v709_v14 = vadd.f32 %v708_v27, %v707_v48 }
 0x190   : > { %v722_v56 = vrot.slane %v721_v53, 2  ;;  %v710_v59 = vrot.slane %v709_v14, 1 }
 0x192   : > { %v723_v50 = vadd.f32 %v722_v56, %v721_v53  ;;  %v711_v61 = vadd.f32 %v710_v59, %v709_v14 }
 0x194   : > { %922 = vpush %v711_v61  ;;  %v724_v31 = vrot.slane %v723_v50, 1 }
 0x196   : > { %v725_v54 = vadd.f32 %v724_v31, %v723_v50 }
 0x198   : > { %924 = vpush %v725_v54 }
 0x1c5   : > { %s923_s25 = spop %922 }
 0x1c6   : > { %v713_v2 = vstv %s923_s25 }
 0x1c7   : > { %715 = vst.msk [vmem:[%s291_s21] sm:$0x1] %vm714_vm2, %v713_v2 }
 0x1c9   : > { %s925_s4 = spop %924 }
 0x1ca   : > { %v727_v1 = vstv %s925_s4 }
 0x1cb   : > { %728 = vst.msk [vmem:[%s297_s28] sm:$0x1] %vm714_vm2, %v727_v1 }
 0x1cc PF: > { %s20_s17 = sadd.s32 1, %s1175_s17   ;;  %s1844_s12 = smov %s1159_s13 }
 0x1cd   : > { %p17_p9 = scmp.ge.s32.totalorder %s20_s17, 4   ;;  %s1845_s13 = smov %s1163_s14 }
 0x1ce   : > { %s1846_s14 = smov %s1247_s23  ;;  %s1847_s15 = smov %s1171_s16 }
 0x1cf   : > { %s1848_s16 = smov %s1850_s19  ;;  %19 = sbr.rel (!%p17_p9) target bundleno = 6 (0x6), region = 137 }
 0x1d4   :  { %770 = vsyncpa [#allocation5], 1 }
 0x1d5   :  { %772 = vsyncpa [#allocation5 + $0x1], 1 }
 0x1d6   :  { %773 = vsyncpa [#allocation7], 1 }
 0x1d7   :  { %775 = vsyncpa [#allocation7 + $0x1], 1 }

</bundles_post_ra>
